<compile_context>
chip_gen: v7x
topology: tpu7x:2x2x1
jax: 0.10.0
libtpu: 0.0.40
codegen_flags: <defaults>
</compile_context>

<pallas_src>
import functools

import jax
import jax.numpy as jnp
from jax import lax
from jax.experimental import pallas as pl
from jax.experimental.pallas import tpu as pltpu


def _make_kernel(Cin, Cout, KH, KW, Wh, LV2p, NB):
    """Fused conv + 2x2 maxpool + bias + ReLU kernel (one batch block / step).

    Refs:
      x_ref : (NB, 4, Cin, LFh)   row/col parity planes (idx = 2*rp + cp),
                                  spatial flattened with virtual row stride Wh.
      w_ref : (Cout, KH*KW*Cin)   conv weights, K axis ordered (kh, kw, cin).
      b_ref : (Cout, 1)           conv bias.
      o_ref : (NB, Cout, LV2p)    pooled+ReLU output, pooled spatial on lanes
                                  (virtual layout: lane = oh2*Wh + ow2).
      xs_ref: (KH*KW*Cin, NB*4*LV2p)  VMEM scratch holding X_flat for ONE dot.
    """

    def kernel(x_ref, w_ref, b_ref, o_ref, xs_ref):
        # ---- Assemble X_flat in VMEM. ---------------------------------------
        # Only 4 planes x (KH//2+1)*(KW//2+1) offsets are distinct (16 for a
        # 3x3 kernel); cache the loads at trace time and reuse the values for
        # every (tap, pool-position) destination row block.
        cache = {}

        def window(b, plane, off):
            key = (b, plane, off)
            if key not in cache:
                cache[key] = x_ref[b, plane, :, pl.ds(off, LV2p)]  # (Cin, LV2p)
            return cache[key]

        for b in range(NB):
            for di in range(2):
                for dj in range(2):
                    col0 = (b * 4 + 2 * di + dj) * LV2p
                    for kh in range(KH):
                        for kw in range(KW):
                            rp, rsh = (di + kh) % 2, (di + kh) // 2
                            cp, csh = (dj + kw) % 2, (dj + kw) // 2
                            val = window(b, 2 * rp + cp, rsh * Wh + csh)
                            row0 = (kh * KW + kw) * Cin
                            xs_ref[pl.ds(row0, Cin), pl.ds(col0, LV2p)] = val

        # ---- One MXU contraction over K = KH*KW*Cin (accumulates in MXU). ---
        acc = jnp.dot(w_ref[...], xs_ref[...],
                      preferred_element_type=jnp.float32)  # (Cout, NB*4*LV2p)

        # ---- 2x2 max-pool == elementwise max over the 4 lane chunks; bias ---
        # and ReLU applied once after the max (mathematically exact).
        bias = b_ref[...]                                   # (Cout, 1)
        for b in range(NB):
            c0 = b * 4 * LV2p
            m = jnp.maximum(
                jnp.maximum(acc[:, c0 + 0 * LV2p:c0 + 1 * LV2p],
                            acc[:, c0 + 1 * LV2p:c0 + 2 * LV2p]),
                jnp.maximum(acc[:, c0 + 2 * LV2p:c0 + 3 * LV2p],
                            acc[:, c0 + 3 * LV2p:c0 + 4 * LV2p]))
            o_ref[b] = jnp.maximum(m + bias, 0.0).astype(o_ref.dtype)

    return kernel


def _default_batch_block(N):
    """How many batch elements to fold into one grid step.

    v5e / v6e (single TensorCore): fold the whole batch into one step (saves
    per-step pipeline overhead and widens the dot's lane dim).
    v7x (2 TensorCores/chip): split an even batch into two parallel grid steps
    so both cores get work.
    """
    try:
        kind = jax.devices()[0].device_kind.lower()
    except Exception:  # pragma: no cover - no devices visible
        kind = ""
    if "v7" in kind and N >= 2 and N % 2 == 0:
        return N // 2
    return N


@functools.partial(jax.jit, static_argnames=("padding", "nb"))
def _bias_conv_impl(x_nchw, weight, bias, padding, nb):
    N, Cin, H, W = x_nchw.shape
    Cout, Cin_w, KH, KW = weight.shape
    assert Cin_w == Cin
    Hp, Wp = H + 2 * padding, W + 2 * padding
    OH, OW = Hp - KH + 1, Wp - KW + 1          # conv output spatial dims
    OH2, OW2 = OH // 2, OW // 2                # after MaxPool2d(2) (floor)
    assert OH2 >= 1 and OW2 >= 1, "pooled output is empty"

    Wh = (Wp + 1) // 2                         # virtual row width (col pairs)
    LV2 = OH2 * Wh                             # pooled rows x virtual width
    LV2p = pl.cdiv(LV2, 128) * 128             # lane-aligned window length
    off_max = (KH // 2) * Wh + (KW // 2)       # largest static window offset

    # Parity-plane rows: enough for all real input rows AND so every in-kernel
    # window read [off, off + LV2p) stays inside the flat buffer.
    Hh = (Hp + 1) // 2
    Hh_ext = max(Hh, pl.cdiv(off_max + LV2p, Wh))
    LFh = Hh_ext * Wh

    # Layout invariants (see review's correctness note): valid output lanes
    # never wrap into the next virtual row, and window reads never run off the
    # end of the flattened plane.
    assert OW2 + KW // 2 <= Wh, (OW2, KW, Wh)
    assert LFh >= off_max + LV2p, (LFh, off_max, LV2p)

    # Single pad (conv padding + parity rounding + window slack), then one
    # reshape/transpose to split into the 4 (row,col)-parity planes.
    xpad = jnp.pad(
        x_nchw,
        ((0, 0), (0, 0),
         (padding, 2 * Hh_ext - H - padding),
         (padding, 2 * Wh - W - padding)))
    xp = xpad.reshape(N, Cin, Hh_ext, 2, Wh, 2)
    xp = xp.transpose(0, 3, 5, 1, 2, 4).reshape(N, 4, Cin, LFh)

    # Weights: K axis ordered (kh, kw, cin) to match the X_flat scratch rows.
    w_flat = jnp.transpose(weight, (0, 2, 3, 1)).reshape(Cout, KH * KW * Cin)
    b2 = bias.reshape(Cout, 1)

    num_blocks = N // nb
    kernel = _make_kernel(Cin, Cout, KH, KW, Wh, LV2p, nb)

    # TODO(synk): for large images, add a second grid axis over pooled-row
    # chunks with a 1-virtual-row halo so the (nb,4,Cin,LFh) block and the
    # (Cout, nb*4*LV2p) accumulator stay inside v7x's 64 MiB VMEM / 64x4 KiB
    # vreg budgets (and to give v7x a parallel axis when N == 1).
    out = pl.pallas_call(
        kernel,
        out_shape=jax.ShapeDtypeStruct((N, Cout, LV2p), x_nchw.dtype),
        grid_spec=pltpu.PrefetchScalarGridSpec(
            num_scalar_prefetch=0,
            grid=(num_blocks,),
            in_specs=[
                pl.BlockSpec((nb, 4, Cin, LFh), lambda g: (g, 0, 0, 0)),
                pl.BlockSpec((Cout, KH * KW * Cin), lambda g: (0, 0)),
                pl.BlockSpec((Cout, 1), lambda g: (0, 0)),
            ],
            out_specs=pl.BlockSpec((nb, Cout, LV2p), lambda g: (g, 0, 0)),
            scratch_shapes=[
                pltpu.VMEM((KH * KW * Cin, nb * 4 * LV2p), jnp.float32)],
        ),
        compiler_params=pltpu.CompilerParams(
            dimension_semantics=("parallel",)),
    )(xp, w_flat, b2)

    # Drop the virtual-width garbage columns; result is already NCHW-ordered.
    out = out[:, :, :LV2].reshape(N, Cout, OH2, Wh)[:, :, :, :OW2]
    return out


def bias_conv_forward(x_nchw, weight, bias, padding=0, batch_block=None):
    """Forward of bias_conv. x_nchw: (N, Cin, H, W); weight: (Cout, Cin, KH, KW)."""
    N = x_nchw.shape[0]
    nb = _default_batch_block(N) if batch_block is None else int(batch_block)
    if N % nb != 0:
        raise ValueError(f"batch {N} not divisible by batch_block {nb}")
    return _bias_conv_impl(x_nchw, weight, bias, padding, nb)


def reference_forward(x_nchw, weight, bias, padding=0):
    """Pure-JAX reference mirroring Conv2d -> MaxPool2d(2) -> ReLU."""
    conv = lax.conv_general_dilated(
        x_nchw, weight, window_strides=(1, 1),
        padding=[(padding, padding), (padding, padding)],
        dimension_numbers=("NCHW", "OIHW", "NCHW"))
    conv = conv + bias.reshape(1, -1, 1, 1)
    N, C, OH, OW = conv.shape
    OH2, OW2 = OH // 2, OW // 2
    conv = conv[:, :, :2 * OH2, :2 * OW2]
    pooled = lax.reduce_window(conv, -jnp.inf, lax.max,
                               (1, 1, 2, 2), (1, 1, 2, 2), "VALID")
    return jnp.maximum(pooled, 0.0)


if __name__ == "__main__":
    # Module config (small, consistent with the forward)
    in_ch, out_ch, ker_size, padding = 4, 8, 3, 1
    N, H, W = 2, 16, 16

    key = jax.random.PRNGKey(0)
    kx, kw, kb = jax.random.split(key, 3)

    # Deterministic Conv2d-style init (uniform in +-1/sqrt(fan_in))
    fan_in = in_ch * ker_size * ker_size
    bound = 1.0 / (fan_in ** 0.5)
    weight = jax.random.uniform(kw, (out_ch, in_ch, ker_size, ker_size),
                                jnp.float32, minval=-bound, maxval=bound)
    bias = jax.random.uniform(kb, (out_ch,), jnp.float32,
                              minval=-bound, maxval=bound)
    x = jax.random.normal(kx, (N, in_ch, H, W), jnp.float32)

    out = bias_conv_forward(x, weight, bias, padding=padding)
    out = jax.block_until_ready(out)

    ref = jax.block_until_ready(reference_forward(x, weight, bias, padding=padding))
    assert out.shape == ref.shape, (out.shape, ref.shape)
    assert jnp.allclose(out, ref, atol=1e-5, rtol=1e-5), "mismatch vs reference"

    print("KERNEL_OK")
</pallas_src>

<mosaic_0001>
module attributes {stable_mosaic.version = 11 : i64} {
  func.func @kernel(%arg0: i32, %arg1: memref<2x4x4x144xf32, #tpu.memory_space<vmem>>, %arg2: memref<8x36xf32, #tpu.memory_space<vmem>>, %arg3: memref<8x1xf32, #tpu.memory_space<vmem>>, %arg4: memref<2x8x128xf32, #tpu.memory_space<vmem>>, %arg5: memref<36x1024xf32, #tpu.memory_space<vmem>>) attributes {dimension_semantics = [#tpu.dimension_semantics<parallel>], iteration_bounds = array<i64: 1>, scalar_prefetch = 0 : i64, scratch_operands = 1 : i64, tpu.core_type = #tpu.core_type<tc>, window_params = [{transform_indices = @transform_0, window_bounds = array<i64: 2, 4, 4, 144>}, {pipeline_mode = #tpu.pipeline_mode<synchronous>, transform_indices = @transform_1, window_bounds = array<i64: 8, 36>}, {pipeline_mode = #tpu.pipeline_mode<synchronous>, transform_indices = @transform_2, window_bounds = array<i64: 8, 1>}, {transform_indices = @transform_3, window_bounds = array<i64: 2, 8, 128>}]} {
    %c0 = arith.constant 0 : index
    %c0_0 = arith.constant 0 : index
    %c0_1 = arith.constant 0 : index
    %c0_2 = arith.constant 0 : index
    %0 = vector.load %arg1[%c0, %c0_0, %c0_1, %c0_2] : memref<2x4x4x144xf32, #tpu.memory_space<vmem>>, vector<1x1x4x128xf32>
    %1 = vector.shape_cast %0 : vector<1x1x4x128xf32> to vector<4x128xf32>
    %c0_3 = arith.constant 0 : index
    %c0_4 = arith.constant 0 : index
    %2 = vector.load %arg5[%c0_3, %c0_4] : memref<36x1024xf32, #tpu.memory_space<vmem>>, vector<4x128xf32>
    tpu.vector_store %arg5[%c0_3, %c0_4], %1 {strides = array<i32>} : memref<36x1024xf32, #tpu.memory_space<vmem>>, vector<4x128xf32>,
    %c0_5 = arith.constant 0 : index
    %c1 = arith.constant 1 : index
    %c0_6 = arith.constant 0 : index
    %c0_7 = arith.constant 0 : index
    %3 = vector.load %arg1[%c0_5, %c1, %c0_6, %c0_7] : memref<2x4x4x144xf32, #tpu.memory_space<vmem>>, vector<1x1x4x128xf32>
    %4 = vector.shape_cast %3 : vector<1x1x4x128xf32> to vector<4x128xf32>
    %c4 = arith.constant 4 : index
    %c0_8 = arith.constant 0 : index
    %5 = vector.load %arg5[%c4, %c0_8] : memref<36x1024xf32, #tpu.memory_space<vmem>>, vector<4x128xf32>
    tpu.vector_store %arg5[%c4, %c0_8], %4 {strides = array<i32>} : memref<36x1024xf32, #tpu.memory_space<vmem>>, vector<4x128xf32>,
    %c0_9 = arith.constant 0 : index
    %c0_10 = arith.constant 0 : index
    %c0_11 = arith.constant 0 : index
    %c1_12 = arith.constant 1 : index
    %6 = vector.load %arg1[%c0_9, %c0_10, %c0_11, %c1_12] : memref<2x4x4x144xf32, #tpu.memory_space<vmem>>, vector<1x1x4x128xf32>
    %7 = vector.shape_cast %6 : vector<1x1x4x128xf32> to vector<4x128xf32>
    %c8 = arith.constant 8 : index
    %c0_13 = arith.constant 0 : index
    %8 = vector.load %arg5[%c8, %c0_13] : memref<36x1024xf32, #tpu.memory_space<vmem>>, vector<4x128xf32>
    tpu.vector_store %arg5[%c8, %c0_13], %7 {strides = array<i32>} : memref<36x1024xf32, #tpu.memory_space<vmem>>, vector<4x128xf32>,
    %c0_14 = arith.constant 0 : index
    %c2 = arith.constant 2 : index
    %c0_15 = arith.constant 0 : index
    %c0_16 = arith.constant 0 : index
    %9 = vector.load %arg1[%c0_14, %c2, %c0_15, %c0_16] : memref<2x4x4x144xf32, #tpu.memory_space<vmem>>, vector<1x1x4x128xf32>
    %10 = vector.shape_cast %9 : vector<1x1x4x128xf32> to vector<4x128xf32>
    %c12 = arith.constant 12 : index
    %c0_17 = arith.constant 0 : index
    %11 = vector.load %arg5[%c12, %c0_17] : memref<36x1024xf32, #tpu.memory_space<vmem>>, vector<4x128xf32>
    tpu.vector_store %arg5[%c12, %c0_17], %10 {strides = array<i32>} : memref<36x1024xf32, #tpu.memory_space<vmem>>, vector<4x128xf32>,
    %c0_18 = arith.constant 0 : index
    %c3 = arith.constant 3 : index
    %c0_19 = arith.constant 0 : index
    %c0_20 = arith.constant 0 : index
    %12 = vector.load %arg1[%c0_18, %c3, %c0_19, %c0_20] : memref<2x4x4x144xf32, #tpu.memory_space<vmem>>, vector<1x1x4x128xf32>
    %13 = vector.shape_cast %12 : vector<1x1x4x128xf32> to vector<4x128xf32>
    %c16 = arith.constant 16 : index
    %c0_21 = arith.constant 0 : index
    %14 = vector.load %arg5[%c16, %c0_21] : memref<36x1024xf32, #tpu.memory_space<vmem>>, vector<4x128xf32>
    tpu.vector_store %arg5[%c16, %c0_21], %13 {strides = array<i32>} : memref<36x1024xf32, #tpu.memory_space<vmem>>, vector<4x128xf32>,
    %c0_22 = arith.constant 0 : index
    %c2_23 = arith.constant 2 : index
    %c0_24 = arith.constant 0 : index
    %c1_25 = arith.constant 1 : index
    %15 = vector.load %arg1[%c0_22, %c2_23, %c0_24, %c1_25] : memref<2x4x4x144xf32, #tpu.memory_space<vmem>>, vector<1x1x4x128xf32>
    %16 = vector.shape_cast %15 : vector<1x1x4x128xf32> to vector<4x128xf32>
    %c20 = arith.constant 20 : index
    %c0_26 = arith.constant 0 : index
    %17 = vector.load %arg5[%c20, %c0_26] : memref<36x1024xf32, #tpu.memory_space<vmem>>, vector<4x128xf32>
    tpu.vector_store %arg5[%c20, %c0_26], %16 {strides = array<i32>} : memref<36x1024xf32, #tpu.memory_space<vmem>>, vector<4x128xf32>,
    %c0_27 = arith.constant 0 : index
    %c0_28 = arith.constant 0 : index
    %c0_29 = arith.constant 0 : index
    %c9 = arith.constant 9 : index
    %18 = vector.load %arg1[%c0_27, %c0_28, %c0_29, %c9] : memref<2x4x4x144xf32, #tpu.memory_space<vmem>>, vector<1x1x4x128xf32>
    %19 = vector.shape_cast %18 : vector<1x1x4x128xf32> to vector<4x128xf32>
    %c24 = arith.constant 24 : index
    %c0_30 = arith.constant 0 : index
    %20 = vector.load %arg5[%c24, %c0_30] : memref<36x1024xf32, #tpu.memory_space<vmem>>, vector<4x128xf32>
    tpu.vector_store %arg5[%c24, %c0_30], %19 {strides = array<i32>} : memref<36x1024xf32, #tpu.memory_space<vmem>>, vector<4x128xf32>,
    %c0_31 = arith.constant 0 : index
    %c1_32 = arith.constant 1 : index
    %c0_33 = arith.constant 0 : index
    %c9_34 = arith.constant 9 : index
    %21 = vector.load %arg1[%c0_31, %c1_32, %c0_33, %c9_34] : memref<2x4x4x144xf32, #tpu.memory_space<vmem>>, vector<1x1x4x128xf32>
    %22 = vector.shape_cast %21 : vector<1x1x4x128xf32> to vector<4x128xf32>
    %c28 = arith.constant 28 : index
    %c0_35 = arith.constant 0 : index
    %23 = vector.load %arg5[%c28, %c0_35] : memref<36x1024xf32, #tpu.memory_space<vmem>>, vector<4x128xf32>
    tpu.vector_store %arg5[%c28, %c0_35], %22 {strides = array<i32>} : memref<36x1024xf32, #tpu.memory_space<vmem>>, vector<4x128xf32>,
    %c0_36 = arith.constant 0 : index
    %c0_37 = arith.constant 0 : index
    %c0_38 = arith.constant 0 : index
    %c10 = arith.constant 10 : index
    %24 = vector.load %arg1[%c0_36, %c0_37, %c0_38, %c10] : memref<2x4x4x144xf32, #tpu.memory_space<vmem>>, vector<1x1x4x128xf32>
    %25 = vector.shape_cast %24 : vector<1x1x4x128xf32> to vector<4x128xf32>
    %c32 = arith.constant 32 : index
    %c0_39 = arith.constant 0 : index
    %26 = vector.load %arg5[%c32, %c0_39] : memref<36x1024xf32, #tpu.memory_space<vmem>>, vector<4x128xf32>
    tpu.vector_store %arg5[%c32, %c0_39], %25 {strides = array<i32>} : memref<36x1024xf32, #tpu.memory_space<vmem>>, vector<4x128xf32>,
    %c0_40 = arith.constant 0 : index
    %c128 = arith.constant 128 : index
    %27 = vector.load %arg5[%c0_40, %c128] : memref<36x1024xf32, #tpu.memory_space<vmem>>, vector<4x128xf32>
    tpu.vector_store %arg5[%c0_40, %c128], %4 {strides = array<i32>} : memref<36x1024xf32, #tpu.memory_space<vmem>>, vector<4x128xf32>,
    %c4_41 = arith.constant 4 : index
    %c128_42 = arith.constant 128 : index
    %28 = vector.load %arg5[%c4_41, %c128_42] : memref<36x1024xf32, #tpu.memory_space<vmem>>, vector<4x128xf32>
    tpu.vector_store %arg5[%c4_41, %c128_42], %7 {strides = array<i32>} : memref<36x1024xf32, #tpu.memory_space<vmem>>, vector<4x128xf32>,
    %c0_43 = arith.constant 0 : index
    %c1_44 = arith.constant 1 : index
    %c0_45 = arith.constant 0 : index
    %c1_46 = arith.constant 1 : index
    %29 = vector.load %arg1[%c0_43, %c1_44, %c0_45, %c1_46] : memref<2x4x4x144xf32, #tpu.memory_space<vmem>>, vector<1x1x4x128xf32>
    %30 = vector.shape_cast %29 : vector<1x1x4x128xf32> to vector<4x128xf32>
    %c8_47 = arith.constant 8 : index
    %c128_48 = arith.constant 128 : index
    %31 = vector.load %arg5[%c8_47, %c128_48] : memref<36x1024xf32, #tpu.memory_space<vmem>>, vector<4x128xf32>
    tpu.vector_store %arg5[%c8_47, %c128_48], %30 {strides = array<i32>} : memref<36x1024xf32, #tpu.memory_space<vmem>>, vector<4x128xf32>,
    %c12_49 = arith.constant 12 : index
    %c128_50 = arith.constant 128 : index
    %32 = vector.load %arg5[%c12_49, %c128_50] : memref<36x1024xf32, #tpu.memory_space<vmem>>, vector<4x128xf32>
    tpu.vector_store %arg5[%c12_49, %c128_50], %13 {strides = array<i32>} : memref<36x1024xf32, #tpu.memory_space<vmem>>, vector<4x128xf32>,
    %c16_51 = arith.constant 16 : index
    %c128_52 = arith.constant 128 : index
    %33 = vector.load %arg5[%c16_51, %c128_52] : memref<36x1024xf32, #tpu.memory_space<vmem>>, vector<4x128xf32>
    tpu.vector_store %arg5[%c16_51, %c128_52], %16 {strides = array<i32>} : memref<36x1024xf32, #tpu.memory_space<vmem>>, vector<4x128xf32>,
    %c0_53 = arith.constant 0 : index
    %c3_54 = arith.constant 3 : index
    %c0_55 = arith.constant 0 : index
    %c1_56 = arith.constant 1 : index
    %34 = vector.load %arg1[%c0_53, %c3_54, %c0_55, %c1_56] : memref<2x4x4x144xf32, #tpu.memory_space<vmem>>, vector<1x1x4x128xf32>
    %35 = vector.shape_cast %34 : vector<1x1x4x128xf32> to vector<4x128xf32>
    %c20_57 = arith.constant 20 : index
    %c128_58 = arith.constant 128 : index
    %36 = vector.load %arg5[%c20_57, %c128_58] : memref<36x1024xf32, #tpu.memory_space<vmem>>, vector<4x128xf32>
    tpu.vector_store %arg5[%c20_57, %c128_58], %35 {strides = array<i32>} : memref<36x1024xf32, #tpu.memory_space<vmem>>, vector<4x128xf32>,
    %c24_59 = arith.constant 24 : index
    %c128_60 = arith.constant 128 : index
    %37 = vector.load %arg5[%c24_59, %c128_60] : memref<36x1024xf32, #tpu.memory_space<vmem>>, vector<4x128xf32>
    tpu.vector_store %arg5[%c24_59, %c128_60], %22 {strides = array<i32>} : memref<36x1024xf32, #tpu.memory_space<vmem>>, vector<4x128xf32>,
    %c28_61 = arith.constant 28 : index
    %c128_62 = arith.constant 128 : index
    %38 = vector.load %arg5[%c28_61, %c128_62] : memref<36x1024xf32, #tpu.memory_space<vmem>>, vector<4x128xf32>
    tpu.vector_store %arg5[%c28_61, %c128_62], %25 {strides = array<i32>} : memref<36x1024xf32, #tpu.memory_space<vmem>>, vector<4x128xf32>,
    %c0_63 = arith.constant 0 : index
    %c1_64 = arith.constant 1 : index
    %c0_65 = arith.constant 0 : index
    %c10_66 = arith.constant 10 : index
    %39 = vector.load %arg1[%c0_63, %c1_64, %c0_65, %c10_66] : memref<2x4x4x144xf32, #tpu.memory_space<vmem>>, vector<1x1x4x128xf32>
    %40 = vector.shape_cast %39 : vector<1x1x4x128xf32> to vector<4x128xf32>
    %c32_67 = arith.constant 32 : index
    %c128_68 = arith.constant 128 : index
    %41 = vector.load %arg5[%c32_67, %c128_68] : memref<36x1024xf32, #tpu.memory_space<vmem>>, vector<4x128xf32>
    tpu.vector_store %arg5[%c32_67, %c128_68], %40 {strides = array<i32>} : memref<36x1024xf32, #tpu.memory_space<vmem>>, vector<4x128xf32>,
    %c0_69 = arith.constant 0 : index
    %c256 = arith.constant 256 : index
    %42 = vector.load %arg5[%c0_69, %c256] : memref<36x1024xf32, #tpu.memory_space<vmem>>, vector<4x128xf32>
    tpu.vector_store %arg5[%c0_69, %c256], %10 {strides = array<i32>} : memref<36x1024xf32, #tpu.memory_space<vmem>>, vector<4x128xf32>,
    %c4_70 = arith.constant 4 : index
    %c256_71 = arith.constant 256 : index
    %43 = vector.load %arg5[%c4_70, %c256_71] : memref<36x1024xf32, #tpu.memory_space<vmem>>, vector<4x128xf32>
    tpu.vector_store %arg5[%c4_70, %c256_71], %13 {strides = array<i32>} : memref<36x1024xf32, #tpu.memory_space<vmem>>, vector<4x128xf32>,
    %c8_72 = arith.constant 8 : index
    %c256_73 = arith.constant 256 : index
    %44 = vector.load %arg5[%c8_72, %c256_73] : memref<36x1024xf32, #tpu.memory_space<vmem>>, vector<4x128xf32>
    tpu.vector_store %arg5[%c8_72, %c256_73], %16 {strides = array<i32>} : memref<36x1024xf32, #tpu.memory_space<vmem>>, vector<4x128xf32>,
    %c12_74 = arith.constant 12 : index
    %c256_75 = arith.constant 256 : index
    %45 = vector.load %arg5[%c12_74, %c256_75] : memref<36x1024xf32, #tpu.memory_space<vmem>>, vector<4x128xf32>
    tpu.vector_store %arg5[%c12_74, %c256_75], %19 {strides = array<i32>} : memref<36x1024xf32, #tpu.memory_space<vmem>>, vector<4x128xf32>,
    %c16_76 = arith.constant 16 : index
    %c256_77 = arith.constant 256 : index
    %46 = vector.load %arg5[%c16_76, %c256_77] : memref<36x1024xf32, #tpu.memory_space<vmem>>, vector<4x128xf32>
    tpu.vector_store %arg5[%c16_76, %c256_77], %22 {strides = array<i32>} : memref<36x1024xf32, #tpu.memory_space<vmem>>, vector<4x128xf32>,
    %c20_78 = arith.constant 20 : index
    %c256_79 = arith.constant 256 : index
    %47 = vector.load %arg5[%c20_78, %c256_79] : memref<36x1024xf32, #tpu.memory_space<vmem>>, vector<4x128xf32>
    tpu.vector_store %arg5[%c20_78, %c256_79], %25 {strides = array<i32>} : memref<36x1024xf32, #tpu.memory_space<vmem>>, vector<4x128xf32>,
    %c0_80 = arith.constant 0 : index
    %c2_81 = arith.constant 2 : index
    %c0_82 = arith.constant 0 : index
    %c9_83 = arith.constant 9 : index
    %48 = vector.load %arg1[%c0_80, %c2_81, %c0_82, %c9_83] : memref<2x4x4x144xf32, #tpu.memory_space<vmem>>, vector<1x1x4x128xf32>
    %49 = vector.shape_cast %48 : vector<1x1x4x128xf32> to vector<4x128xf32>
    %c24_84 = arith.constant 24 : index
    %c256_85 = arith.constant 256 : index
    %50 = vector.load %arg5[%c24_84, %c256_85] : memref<36x1024xf32, #tpu.memory_space<vmem>>, vector<4x128xf32>
    tpu.vector_store %arg5[%c24_84, %c256_85], %49 {strides = array<i32>} : memref<36x1024xf32, #tpu.memory_space<vmem>>, vector<4x128xf32>,
    %c0_86 = arith.constant 0 : index
    %c3_87 = arith.constant 3 : index
    %c0_88 = arith.constant 0 : index
    %c9_89 = arith.constant 9 : index
    %51 = vector.load %arg1[%c0_86, %c3_87, %c0_88, %c9_89] : memref<2x4x4x144xf32, #tpu.memory_space<vmem>>, vector<1x1x4x128xf32>
    %52 = vector.shape_cast %51 : vector<1x1x4x128xf32> to vector<4x128xf32>
    %c28_90 = arith.constant 28 : index
    %c256_91 = arith.constant 256 : index
    %53 = vector.load %arg5[%c28_90, %c256_91] : memref<36x1024xf32, #tpu.memory_space<vmem>>, vector<4x128xf32>
    tpu.vector_store %arg5[%c28_90, %c256_91], %52 {strides = array<i32>} : memref<36x1024xf32, #tpu.memory_space<vmem>>, vector<4x128xf32>,
    %c0_92 = arith.constant 0 : index
    %c2_93 = arith.constant 2 : index
    %c0_94 = arith.constant 0 : index
    %c10_95 = arith.constant 10 : index
    %54 = vector.load %arg1[%c0_92, %c2_93, %c0_94, %c10_95] : memref<2x4x4x144xf32, #tpu.memory_space<vmem>>, vector<1x1x4x128xf32>
    %55 = vector.shape_cast %54 : vector<1x1x4x128xf32> to vector<4x128xf32>
    %c32_96 = arith.constant 32 : index
    %c256_97 = arith.constant 256 : index
    %56 = vector.load %arg5[%c32_96, %c256_97] : memref<36x1024xf32, #tpu.memory_space<vmem>>, vector<4x128xf32>
    tpu.vector_store %arg5[%c32_96, %c256_97], %55 {strides = array<i32>} : memref<36x1024xf32, #tpu.memory_space<vmem>>, vector<4x128xf32>,
    %c0_98 = arith.constant 0 : index
    %c384 = arith.constant 384 : index
    %57 = vector.load %arg5[%c0_98, %c384] : memref<36x1024xf32, #tpu.memory_space<vmem>>, vector<4x128xf32>
    tpu.vector_store %arg5[%c0_98, %c384], %13 {strides = array<i32>} : memref<36x1024xf32, #tpu.memory_space<vmem>>, vector<4x128xf32>,
    %c4_99 = arith.constant 4 : index
    %c384_100 = arith.constant 384 : index
    %58 = vector.load %arg5[%c4_99, %c384_100] : memref<36x1024xf32, #tpu.memory_space<vmem>>, vector<4x128xf32>
    tpu.vector_store %arg5[%c4_99, %c384_100], %16 {strides = array<i32>} : memref<36x1024xf32, #tpu.memory_space<vmem>>, vector<4x128xf32>,
    %c8_101 = arith.constant 8 : index
    %c384_102 = arith.constant 384 : index
    %59 = vector.load %arg5[%c8_101, %c384_102] : memref<36x1024xf32, #tpu.memory_space<vmem>>, vector<4x128xf32>
    tpu.vector_store %arg5[%c8_101, %c384_102], %35 {strides = array<i32>} : memref<36x1024xf32, #tpu.memory_space<vmem>>, vector<4x128xf32>,
    %c12_103 = arith.constant 12 : index
    %c384_104 = arith.constant 384 : index
    %60 = vector.load %arg5[%c12_103, %c384_104] : memref<36x1024xf32, #tpu.memory_space<vmem>>, vector<4x128xf32>
    tpu.vector_store %arg5[%c12_103, %c384_104], %22 {strides = array<i32>} : memref<36x1024xf32, #tpu.memory_space<vmem>>, vector<4x128xf32>,
    %c16_105 = arith.constant 16 : index
    %c384_106 = arith.constant 384 : index
    %61 = vector.load %arg5[%c16_105, %c384_106] : memref<36x1024xf32, #tpu.memory_space<vmem>>, vector<4x128xf32>
    tpu.vector_store %arg5[%c16_105, %c384_106], %25 {strides = array<i32>} : memref<36x1024xf32, #tpu.memory_space<vmem>>, vector<4x128xf32>,
    %c20_107 = arith.constant 20 : index
    %c384_108 = arith.constant 384 : index
    %62 = vector.load %arg5[%c20_107, %c384_108] : memref<36x1024xf32, #tpu.memory_space<vmem>>, vector<4x128xf32>
    tpu.vector_store %arg5[%c20_107, %c384_108], %40 {strides = array<i32>} : memref<36x1024xf32, #tpu.memory_space<vmem>>, vector<4x128xf32>,
    %c24_109 = arith.constant 24 : index
    %c384_110 = arith.constant 384 : index
    %63 = vector.load %arg5[%c24_109, %c384_110] : memref<36x1024xf32, #tpu.memory_space<vmem>>, vector<4x128xf32>
    tpu.vector_store %arg5[%c24_109, %c384_110], %52 {strides = array<i32>} : memref<36x1024xf32, #tpu.memory_space<vmem>>, vector<4x128xf32>,
    %c28_111 = arith.constant 28 : index
    %c384_112 = arith.constant 384 : index
    %64 = vector.load %arg5[%c28_111, %c384_112] : memref<36x1024xf32, #tpu.memory_space<vmem>>, vector<4x128xf32>
    tpu.vector_store %arg5[%c28_111, %c384_112], %55 {strides = array<i32>} : memref<36x1024xf32, #tpu.memory_space<vmem>>, vector<4x128xf32>,
    %c0_113 = arith.constant 0 : index
    %c3_114 = arith.constant 3 : index
    %c0_115 = arith.constant 0 : index
    %c10_116 = arith.constant 10 : index
    %65 = vector.load %arg1[%c0_113, %c3_114, %c0_115, %c10_116] : memref<2x4x4x144xf32, #tpu.memory_space<vmem>>, vector<1x1x4x128xf32>
    %66 = vector.shape_cast %65 : vector<1x1x4x128xf32> to vector<4x128xf32>
    %c32_117 = arith.constant 32 : index
    %c384_118 = arith.constant 384 : index
    %67 = vector.load %arg5[%c32_117, %c384_118] : memref<36x1024xf32, #tpu.memory_space<vmem>>, vector<4x128xf32>
    tpu.vector_store %arg5[%c32_117, %c384_118], %66 {strides = array<i32>} : memref<36x1024xf32, #tpu.memory_space<vmem>>, vector<4x128xf32>,
    %c1_119 = arith.constant 1 : index
    %c0_120 = arith.constant 0 : index
    %c0_121 = arith.constant 0 : index
    %c0_122 = arith.constant 0 : index
    %68 = vector.load %arg1[%c1_119, %c0_120, %c0_121, %c0_122] : memref<2x4x4x144xf32, #tpu.memory_space<vmem>>, vector<1x1x4x128xf32>
    %69 = vector.shape_cast %68 : vector<1x1x4x128xf32> to vector<4x128xf32>
    %c0_123 = arith.constant 0 : index
    %c512 = arith.constant 512 : index
    %70 = vector.load %arg5[%c0_123, %c512] : memref<36x1024xf32, #tpu.memory_space<vmem>>, vector<4x128xf32>
    tpu.vector_store %arg5[%c0_123, %c512], %69 {strides = array<i32>} : memref<36x1024xf32, #tpu.memory_space<vmem>>, vector<4x128xf32>,
    %c1_124 = arith.constant 1 : index
    %c1_125 = arith.constant 1 : index
    %c0_126 = arith.constant 0 : index
    %c0_127 = arith.constant 0 : index
    %71 = vector.load %arg1[%c1_124, %c1_125, %c0_126, %c0_127] : memref<2x4x4x144xf32, #tpu.memory_space<vmem>>, vector<1x1x4x128xf32>
    %72 = vector.shape_cast %71 : vector<1x1x4x128xf32> to vector<4x128xf32>
    %c4_128 = arith.constant 4 : index
    %c512_129 = arith.constant 512 : index
    %73 = vector.load %arg5[%c4_128, %c512_129] : memref<36x1024xf32, #tpu.memory_space<vmem>>, vector<4x128xf32>
    tpu.vector_store %arg5[%c4_128, %c512_129], %72 {strides = array<i32>} : memref<36x1024xf32, #tpu.memory_space<vmem>>, vector<4x128xf32>,
    %c1_130 = arith.constant 1 : index
    %c0_131 = arith.constant 0 : index
    %c0_132 = arith.constant 0 : index
    %c1_133 = arith.constant 1 : index
    %74 = vector.load %arg1[%c1_130, %c0_131, %c0_132, %c1_133] : memref<2x4x4x144xf32, #tpu.memory_space<vmem>>, vector<1x1x4x128xf32>
    %75 = vector.shape_cast %74 : vector<1x1x4x128xf32> to vector<4x128xf32>
    %c8_134 = arith.constant 8 : index
    %c512_135 = arith.constant 512 : index
    %76 = vector.load %arg5[%c8_134, %c512_135] : memref<36x1024xf32, #tpu.memory_space<vmem>>, vector<4x128xf32>
    tpu.vector_store %arg5[%c8_134, %c512_135], %75 {strides = array<i32>} : memref<36x1024xf32, #tpu.memory_space<vmem>>, vector<4x128xf32>,
    %c1_136 = arith.constant 1 : index
    %c2_137 = arith.constant 2 : index
    %c0_138 = arith.constant 0 : index
    %c0_139 = arith.constant 0 : index
    %77 = vector.load %arg1[%c1_136, %c2_137, %c0_138, %c0_139] : memref<2x4x4x144xf32, #tpu.memory_space<vmem>>, vector<1x1x4x128xf32>
    %78 = vector.shape_cast %77 : vector<1x1x4x128xf32> to vector<4x128xf32>
    %c12_140 = arith.constant 12 : index
    %c512_141 = arith.constant 512 : index
    %79 = vector.load %arg5[%c12_140, %c512_141] : memref<36x1024xf32, #tpu.memory_space<vmem>>, vector<4x128xf32>
    tpu.vector_store %arg5[%c12_140, %c512_141], %78 {strides = array<i32>} : memref<36x1024xf32, #tpu.memory_space<vmem>>, vector<4x128xf32>,
    %c1_142 = arith.constant 1 : index
    %c3_143 = arith.constant 3 : index
    %c0_144 = arith.constant 0 : index
    %c0_145 = arith.constant 0 : index
    %80 = vector.load %arg1[%c1_142, %c3_143, %c0_144, %c0_145] : memref<2x4x4x144xf32, #tpu.memory_space<vmem>>, vector<1x1x4x128xf32>
    %81 = vector.shape_cast %80 : vector<1x1x4x128xf32> to vector<4x128xf32>
    %c16_146 = arith.constant 16 : index
    %c512_147 = arith.constant 512 : index
    %82 = vector.load %arg5[%c16_146, %c512_147] : memref<36x1024xf32, #tpu.memory_space<vmem>>, vector<4x128xf32>
    tpu.vector_store %arg5[%c16_146, %c512_147], %81 {strides = array<i32>} : memref<36x1024xf32, #tpu.memory_space<vmem>>, vector<4x128xf32>,
    %c1_148 = arith.constant 1 : index
    %c2_149 = arith.constant 2 : index
    %c0_150 = arith.constant 0 : index
    %c1_151 = arith.constant 1 : index
    %83 = vector.load %arg1[%c1_148, %c2_149, %c0_150, %c1_151] : memref<2x4x4x144xf32, #tpu.memory_space<vmem>>, vector<1x1x4x128xf32>
    %84 = vector.shape_cast %83 : vector<1x1x4x128xf32> to vector<4x128xf32>
    %c20_152 = arith.constant 20 : index
    %c512_153 = arith.constant 512 : index
    %85 = vector.load %arg5[%c20_152, %c512_153] : memref<36x1024xf32, #tpu.memory_space<vmem>>, vector<4x128xf32>
    tpu.vector_store %arg5[%c20_152, %c512_153], %84 {strides = array<i32>} : memref<36x1024xf32, #tpu.memory_space<vmem>>, vector<4x128xf32>,
    %c1_154 = arith.constant 1 : index
    %c0_155 = arith.constant 0 : index
    %c0_156 = arith.constant 0 : index
    %c9_157 = arith.constant 9 : index
    %86 = vector.load %arg1[%c1_154, %c0_155, %c0_156, %c9_157] : memref<2x4x4x144xf32, #tpu.memory_space<vmem>>, vector<1x1x4x128xf32>
    %87 = vector.shape_cast %86 : vector<1x1x4x128xf32> to vector<4x128xf32>
    %c24_158 = arith.constant 24 : index
    %c512_159 = arith.constant 512 : index
    %88 = vector.load %arg5[%c24_158, %c512_159] : memref<36x1024xf32, #tpu.memory_space<vmem>>, vector<4x128xf32>
    tpu.vector_store %arg5[%c24_158, %c512_159], %87 {strides = array<i32>} : memref<36x1024xf32, #tpu.memory_space<vmem>>, vector<4x128xf32>,
    %c1_160 = arith.constant 1 : index
    %c1_161 = arith.constant 1 : index
    %c0_162 = arith.constant 0 : index
    %c9_163 = arith.constant 9 : index
    %89 = vector.load %arg1[%c1_160, %c1_161, %c0_162, %c9_163] : memref<2x4x4x144xf32, #tpu.memory_space<vmem>>, vector<1x1x4x128xf32>
    %90 = vector.shape_cast %89 : vector<1x1x4x128xf32> to vector<4x128xf32>
    %c28_164 = arith.constant 28 : index
    %c512_165 = arith.constant 512 : index
    %91 = vector.load %arg5[%c28_164, %c512_165] : memref<36x1024xf32, #tpu.memory_space<vmem>>, vector<4x128xf32>
    tpu.vector_store %arg5[%c28_164, %c512_165], %90 {strides = array<i32>} : memref<36x1024xf32, #tpu.memory_space<vmem>>, vector<4x128xf32>,
    %c1_166 = arith.constant 1 : index
    %c0_167 = arith.constant 0 : index
    %c0_168 = arith.constant 0 : index
    %c10_169 = arith.constant 10 : index
    %92 = vector.load %arg1[%c1_166, %c0_167, %c0_168, %c10_169] : memref<2x4x4x144xf32, #tpu.memory_space<vmem>>, vector<1x1x4x128xf32>
    %93 = vector.shape_cast %92 : vector<1x1x4x128xf32> to vector<4x128xf32>
    %c32_170 = arith.constant 32 : index
    %c512_171 = arith.constant 512 : index
    %94 = vector.load %arg5[%c32_170, %c512_171] : memref<36x1024xf32, #tpu.memory_space<vmem>>, vector<4x128xf32>
    tpu.vector_store %arg5[%c32_170, %c512_171], %93 {strides = array<i32>} : memref<36x1024xf32, #tpu.memory_space<vmem>>, vector<4x128xf32>,
    %c0_172 = arith.constant 0 : index
    %c640 = arith.constant 640 : index
    %95 = vector.load %arg5[%c0_172, %c640] : memref<36x1024xf32, #tpu.memory_space<vmem>>, vector<4x128xf32>
    tpu.vector_store %arg5[%c0_172, %c640], %72 {strides = array<i32>} : memref<36x1024xf32, #tpu.memory_space<vmem>>, vector<4x128xf32>,
    %c4_173 = arith.constant 4 : index
    %c640_174 = arith.constant 640 : index
    %96 = vector.load %arg5[%c4_173, %c640_174] : memref<36x1024xf32, #tpu.memory_space<vmem>>, vector<4x128xf32>
    tpu.vector_store %arg5[%c4_173, %c640_174], %75 {strides = array<i32>} : memref<36x1024xf32, #tpu.memory_space<vmem>>, vector<4x128xf32>,
    %c1_175 = arith.constant 1 : index
    %c1_176 = arith.constant 1 : index
    %c0_177 = arith.constant 0 : index
    %c1_178 = arith.constant 1 : index
    %97 = vector.load %arg1[%c1_175, %c1_176, %c0_177, %c1_178] : memref<2x4x4x144xf32, #tpu.memory_space<vmem>>, vector<1x1x4x128xf32>
    %98 = vector.shape_cast %97 : vector<1x1x4x128xf32> to vector<4x128xf32>
    %c8_179 = arith.constant 8 : index
    %c640_180 = arith.constant 640 : index
    %99 = vector.load %arg5[%c8_179, %c640_180] : memref<36x1024xf32, #tpu.memory_space<vmem>>, vector<4x128xf32>
    tpu.vector_store %arg5[%c8_179, %c640_180], %98 {strides = array<i32>} : memref<36x1024xf32, #tpu.memory_space<vmem>>, vector<4x128xf32>,
    %c12_181 = arith.constant 12 : index
    %c640_182 = arith.constant 640 : index
    %100 = vector.load %arg5[%c12_181, %c640_182] : memref<36x1024xf32, #tpu.memory_space<vmem>>, vector<4x128xf32>
    tpu.vector_store %arg5[%c12_181, %c640_182], %81 {strides = array<i32>} : memref<36x1024xf32, #tpu.memory_space<vmem>>, vector<4x128xf32>,
    %c16_183 = arith.constant 16 : index
    %c640_184 = arith.constant 640 : index
    %101 = vector.load %arg5[%c16_183, %c640_184] : memref<36x1024xf32, #tpu.memory_space<vmem>>, vector<4x128xf32>
    tpu.vector_store %arg5[%c16_183, %c640_184], %84 {strides = array<i32>} : memref<36x1024xf32, #tpu.memory_space<vmem>>, vector<4x128xf32>,
    %c1_185 = arith.constant 1 : index
    %c3_186 = arith.constant 3 : index
    %c0_187 = arith.constant 0 : index
    %c1_188 = arith.constant 1 : index
    %102 = vector.load %arg1[%c1_185, %c3_186, %c0_187, %c1_188] : memref<2x4x4x144xf32, #tpu.memory_space<vmem>>, vector<1x1x4x128xf32>
    %103 = vector.shape_cast %102 : vector<1x1x4x128xf32> to vector<4x128xf32>
    %c20_189 = arith.constant 20 : index
    %c640_190 = arith.constant 640 : index
    %104 = vector.load %arg5[%c20_189, %c640_190] : memref<36x1024xf32, #tpu.memory_space<vmem>>, vector<4x128xf32>
    tpu.vector_store %arg5[%c20_189, %c640_190], %103 {strides = array<i32>} : memref<36x1024xf32, #tpu.memory_space<vmem>>, vector<4x128xf32>,
    %c24_191 = arith.constant 24 : index
    %c640_192 = arith.constant 640 : index
    %105 = vector.load %arg5[%c24_191, %c640_192] : memref<36x1024xf32, #tpu.memory_space<vmem>>, vector<4x128xf32>
    tpu.vector_store %arg5[%c24_191, %c640_192], %90 {strides = array<i32>} : memref<36x1024xf32, #tpu.memory_space<vmem>>, vector<4x128xf32>,
    %c28_193 = arith.constant 28 : index
    %c640_194 = arith.constant 640 : index
    %106 = vector.load %arg5[%c28_193, %c640_194] : memref<36x1024xf32, #tpu.memory_space<vmem>>, vector<4x128xf32>
    tpu.vector_store %arg5[%c28_193, %c640_194], %93 {strides = array<i32>} : memref<36x1024xf32, #tpu.memory_space<vmem>>, vector<4x128xf32>,
    %c1_195 = arith.constant 1 : index
    %c1_196 = arith.constant 1 : index
    %c0_197 = arith.constant 0 : index
    %c10_198 = arith.constant 10 : index
    %107 = vector.load %arg1[%c1_195, %c1_196, %c0_197, %c10_198] : memref<2x4x4x144xf32, #tpu.memory_space<vmem>>, vector<1x1x4x128xf32>
    %108 = vector.shape_cast %107 : vector<1x1x4x128xf32> to vector<4x128xf32>
    %c32_199 = arith.constant 32 : index
    %c640_200 = arith.constant 640 : index
    %109 = vector.load %arg5[%c32_199, %c640_200] : memref<36x1024xf32, #tpu.memory_space<vmem>>, vector<4x128xf32>
    tpu.vector_store %arg5[%c32_199, %c640_200], %108 {strides = array<i32>} : memref<36x1024xf32, #tpu.memory_space<vmem>>, vector<4x128xf32>,
    %c0_201 = arith.constant 0 : index
    %c768 = arith.constant 768 : index
    %110 = vector.load %arg5[%c0_201, %c768] : memref<36x1024xf32, #tpu.memory_space<vmem>>, vector<4x128xf32>
    tpu.vector_store %arg5[%c0_201, %c768], %78 {strides = array<i32>} : memref<36x1024xf32, #tpu.memory_space<vmem>>, vector<4x128xf32>,
    %c4_202 = arith.constant 4 : index
    %c768_203 = arith.constant 768 : index
    %111 = vector.load %arg5[%c4_202, %c768_203] : memref<36x1024xf32, #tpu.memory_space<vmem>>, vector<4x128xf32>
    tpu.vector_store %arg5[%c4_202, %c768_203], %81 {strides = array<i32>} : memref<36x1024xf32, #tpu.memory_space<vmem>>, vector<4x128xf32>,
    %c8_204 = arith.constant 8 : index
    %c768_205 = arith.constant 768 : index
    %112 = vector.load %arg5[%c8_204, %c768_205] : memref<36x1024xf32, #tpu.memory_space<vmem>>, vector<4x128xf32>
    tpu.vector_store %arg5[%c8_204, %c768_205], %84 {strides = array<i32>} : memref<36x1024xf32, #tpu.memory_space<vmem>>, vector<4x128xf32>,
    %c12_206 = arith.constant 12 : index
    %c768_207 = arith.constant 768 : index
    %113 = vector.load %arg5[%c12_206, %c768_207] : memref<36x1024xf32, #tpu.memory_space<vmem>>, vector<4x128xf32>
    tpu.vector_store %arg5[%c12_206, %c768_207], %87 {strides = array<i32>} : memref<36x1024xf32, #tpu.memory_space<vmem>>, vector<4x128xf32>,
    %c16_208 = arith.constant 16 : index
    %c768_209 = arith.constant 768 : index
    %114 = vector.load %arg5[%c16_208, %c768_209] : memref<36x1024xf32, #tpu.memory_space<vmem>>, vector<4x128xf32>
    tpu.vector_store %arg5[%c16_208, %c768_209], %90 {strides = array<i32>} : memref<36x1024xf32, #tpu.memory_space<vmem>>, vector<4x128xf32>,
    %c20_210 = arith.constant 20 : index
    %c768_211 = arith.constant 768 : index
    %115 = vector.load %arg5[%c20_210, %c768_211] : memref<36x1024xf32, #tpu.memory_space<vmem>>, vector<4x128xf32>
    tpu.vector_store %arg5[%c20_210, %c768_211], %93 {strides = array<i32>} : memref<36x1024xf32, #tpu.memory_space<vmem>>, vector<4x128xf32>,
    %c1_212 = arith.constant 1 : index
    %c2_213 = arith.constant 2 : index
    %c0_214 = arith.constant 0 : index
    %c9_215 = arith.constant 9 : index
    %116 = vector.load %arg1[%c1_212, %c2_213, %c0_214, %c9_215] : memref<2x4x4x144xf32, #tpu.memory_space<vmem>>, vector<1x1x4x128xf32>
    %117 = vector.shape_cast %116 : vector<1x1x4x128xf32> to vector<4x128xf32>
    %c24_216 = arith.constant 24 : index
    %c768_217 = arith.constant 768 : index
    %118 = vector.load %arg5[%c24_216, %c768_217] : memref<36x1024xf32, #tpu.memory_space<vmem>>, vector<4x128xf32>
    tpu.vector_store %arg5[%c24_216, %c768_217], %117 {strides = array<i32>} : memref<36x1024xf32, #tpu.memory_space<vmem>>, vector<4x128xf32>,
    %c1_218 = arith.constant 1 : index
    %c3_219 = arith.constant 3 : index
    %c0_220 = arith.constant 0 : index
    %c9_221 = arith.constant 9 : index
    %119 = vector.load %arg1[%c1_218, %c3_219, %c0_220, %c9_221] : memref<2x4x4x144xf32, #tpu.memory_space<vmem>>, vector<1x1x4x128xf32>
    %120 = vector.shape_cast %119 : vector<1x1x4x128xf32> to vector<4x128xf32>
    %c28_222 = arith.constant 28 : index
    %c768_223 = arith.constant 768 : index
    %121 = vector.load %arg5[%c28_222, %c768_223] : memref<36x1024xf32, #tpu.memory_space<vmem>>, vector<4x128xf32>
    tpu.vector_store %arg5[%c28_222, %c768_223], %120 {strides = array<i32>} : memref<36x1024xf32, #tpu.memory_space<vmem>>, vector<4x128xf32>,
    %c1_224 = arith.constant 1 : index
    %c2_225 = arith.constant 2 : index
    %c0_226 = arith.constant 0 : index
    %c10_227 = arith.constant 10 : index
    %122 = vector.load %arg1[%c1_224, %c2_225, %c0_226, %c10_227] : memref<2x4x4x144xf32, #tpu.memory_space<vmem>>, vector<1x1x4x128xf32>
    %123 = vector.shape_cast %122 : vector<1x1x4x128xf32> to vector<4x128xf32>
    %c32_228 = arith.constant 32 : index
    %c768_229 = arith.constant 768 : index
    %124 = vector.load %arg5[%c32_228, %c768_229] : memref<36x1024xf32, #tpu.memory_space<vmem>>, vector<4x128xf32>
    tpu.vector_store %arg5[%c32_228, %c768_229], %123 {strides = array<i32>} : memref<36x1024xf32, #tpu.memory_space<vmem>>, vector<4x128xf32>,
    %c0_230 = arith.constant 0 : index
    %c896 = arith.constant 896 : index
    %125 = vector.load %arg5[%c0_230, %c896] : memref<36x1024xf32, #tpu.memory_space<vmem>>, vector<4x128xf32>
    tpu.vector_store %arg5[%c0_230, %c896], %81 {strides = array<i32>} : memref<36x1024xf32, #tpu.memory_space<vmem>>, vector<4x128xf32>,
    %c4_231 = arith.constant 4 : index
    %c896_232 = arith.constant 896 : index
    %126 = vector.load %arg5[%c4_231, %c896_232] : memref<36x1024xf32, #tpu.memory_space<vmem>>, vector<4x128xf32>
    tpu.vector_store %arg5[%c4_231, %c896_232], %84 {strides = array<i32>} : memref<36x1024xf32, #tpu.memory_space<vmem>>, vector<4x128xf32>,
    %c8_233 = arith.constant 8 : index
    %c896_234 = arith.constant 896 : index
    %127 = vector.load %arg5[%c8_233, %c896_234] : memref<36x1024xf32, #tpu.memory_space<vmem>>, vector<4x128xf32>
    tpu.vector_store %arg5[%c8_233, %c896_234], %103 {strides = array<i32>} : memref<36x1024xf32, #tpu.memory_space<vmem>>, vector<4x128xf32>,
    %c12_235 = arith.constant 12 : index
    %c896_236 = arith.constant 896 : index
    %128 = vector.load %arg5[%c12_235, %c896_236] : memref<36x1024xf32, #tpu.memory_space<vmem>>, vector<4x128xf32>
    tpu.vector_store %arg5[%c12_235, %c896_236], %90 {strides = array<i32>} : memref<36x1024xf32, #tpu.memory_space<vmem>>, vector<4x128xf32>,
    %c16_237 = arith.constant 16 : index
    %c896_238 = arith.constant 896 : index
    %129 = vector.load %arg5[%c16_237, %c896_238] : memref<36x1024xf32, #tpu.memory_space<vmem>>, vector<4x128xf32>
    tpu.vector_store %arg5[%c16_237, %c896_238], %93 {strides = array<i32>} : memref<36x1024xf32, #tpu.memory_space<vmem>>, vector<4x128xf32>,
    %c20_239 = arith.constant 20 : index
    %c896_240 = arith.constant 896 : index
    %130 = vector.load %arg5[%c20_239, %c896_240] : memref<36x1024xf32, #tpu.memory_space<vmem>>, vector<4x128xf32>
    tpu.vector_store %arg5[%c20_239, %c896_240], %108 {strides = array<i32>} : memref<36x1024xf32, #tpu.memory_space<vmem>>, vector<4x128xf32>,
    %c24_241 = arith.constant 24 : index
    %c896_242 = arith.constant 896 : index
    %131 = vector.load %arg5[%c24_241, %c896_242] : memref<36x1024xf32, #tpu.memory_space<vmem>>, vector<4x128xf32>
    tpu.vector_store %arg5[%c24_241, %c896_242], %120 {strides = array<i32>} : memref<36x1024xf32, #tpu.memory_space<vmem>>, vector<4x128xf32>,
    %c28_243 = arith.constant 28 : index
    %c896_244 = arith.constant 896 : index
    %132 = vector.load %arg5[%c28_243, %c896_244] : memref<36x1024xf32, #tpu.memory_space<vmem>>, vector<4x128xf32>
    tpu.vector_store %arg5[%c28_243, %c896_244], %123 {strides = array<i32>} : memref<36x1024xf32, #tpu.memory_space<vmem>>, vector<4x128xf32>,
    %c1_245 = arith.constant 1 : index
    %c3_246 = arith.constant 3 : index
    %c0_247 = arith.constant 0 : index
    %c10_248 = arith.constant 10 : index
    %133 = vector.load %arg1[%c1_245, %c3_246, %c0_247, %c10_248] : memref<2x4x4x144xf32, #tpu.memory_space<vmem>>, vector<1x1x4x128xf32>
    %134 = vector.shape_cast %133 : vector<1x1x4x128xf32> to vector<4x128xf32>
    %c32_249 = arith.constant 32 : index
    %c896_250 = arith.constant 896 : index
    %135 = vector.load %arg5[%c32_249, %c896_250] : memref<36x1024xf32, #tpu.memory_space<vmem>>, vector<4x128xf32>
    tpu.vector_store %arg5[%c32_249, %c896_250], %134 {strides = array<i32>} : memref<36x1024xf32, #tpu.memory_space<vmem>>, vector<4x128xf32>,
    %c0_251 = arith.constant 0 : index
    %c0_252 = arith.constant 0 : index
    %136 = vector.load %arg2[%c0_251, %c0_252] : memref<8x36xf32, #tpu.memory_space<vmem>>, vector<8x36xf32>
    %c0_253 = arith.constant 0 : index
    %c0_254 = arith.constant 0 : index
    %137 = vector.load %arg5[%c0_253, %c0_254] : memref<36x1024xf32, #tpu.memory_space<vmem>>, vector<36x1024xf32>
    %cst = arith.constant dense<0.000000e+00> : vector<8x1024xf32>
    %138 = tpu.matmul %136, %137, %cst {dimension_numbers = #tpu.dot_dimension_numbers<[1], [0], [0], [1], [0, 0, 1, 1], [], []>} : vector<8x36xf32>, vector<36x1024xf32>, vector<8x1024xf32> -> vector<8x1024xf32>
    %c0_255 = arith.constant 0 : index
    %c0_256 = arith.constant 0 : index
    %139 = vector.load %arg3[%c0_255, %c0_256] : memref<8x1xf32, #tpu.memory_space<vmem>>, vector<8x1xf32>
    %140 = vector.extract_strided_slice %138 {offsets = [0, 0], sizes = [8, 128], strides = [1, 1]} : vector<8x1024xf32> to vector<8x128xf32>
    %141 = vector.extract_strided_slice %138 {offsets = [0, 128], sizes = [8, 128], strides = [1, 1]} : vector<8x1024xf32> to vector<8x128xf32>
    %142 = arith.maximumf %140, %141 : vector<8x128xf32>
    %143 = vector.extract_strided_slice %138 {offsets = [0, 256], sizes = [8, 128], strides = [1, 1]} : vector<8x1024xf32> to vector<8x128xf32>
    %144 = vector.extract_strided_slice %138 {offsets = [0, 384], sizes = [8, 128], strides = [1, 1]} : vector<8x1024xf32> to vector<8x128xf32>
    %145 = arith.maximumf %143, %144 : vector<8x128xf32>
    %146 = arith.maximumf %142, %145 : vector<8x128xf32>
    %147 = vector.broadcast %139 : vector<8x1xf32> to vector<8x128xf32>
    %148 = arith.addf %146, %147 : vector<8x128xf32>
    %cst_257 = arith.constant 0.000000e+00 : f32
    %149 = vector.broadcast %cst_257 : f32 to vector<8x128xf32>
    %150 = arith.maximumf %148, %149 : vector<8x128xf32>
    %c0_258 = arith.constant 0 : index
    %c0_259 = arith.constant 0 : index
    %c0_260 = arith.constant 0 : index
    %151 = vector.load %arg4[%c0_258, %c0_259, %c0_260] : memref<2x8x128xf32, #tpu.memory_space<vmem>>, vector<1x8x128xf32>
    %152 = vector.shape_cast %151 : vector<1x8x128xf32> to vector<8x128xf32>
    %153 = vector.shape_cast %150 : vector<8x128xf32> to vector<1x8x128xf32>
    tpu.vector_store %arg4[%c0_258, %c0_259, %c0_260], %153 {strides = array<i32>} : memref<2x8x128xf32, #tpu.memory_space<vmem>>, vector<1x8x128xf32>,
    %154 = vector.extract_strided_slice %138 {offsets = [0, 512], sizes = [8, 128], strides = [1, 1]} : vector<8x1024xf32> to vector<8x128xf32>
    %155 = vector.extract_strided_slice %138 {offsets = [0, 640], sizes = [8, 128], strides = [1, 1]} : vector<8x1024xf32> to vector<8x128xf32>
    %156 = arith.maximumf %154, %155 : vector<8x128xf32>
    %157 = vector.extract_strided_slice %138 {offsets = [0, 768], sizes = [8, 128], strides = [1, 1]} : vector<8x1024xf32> to vector<8x128xf32>
    %158 = vector.extract_strided_slice %138 {offsets = [0, 896], sizes = [8, 128], strides = [1, 1]} : vector<8x1024xf32> to vector<8x128xf32>
    %159 = arith.maximumf %157, %158 : vector<8x128xf32>
    %160 = arith.maximumf %156, %159 : vector<8x128xf32>
    %161 = vector.broadcast %139 : vector<8x1xf32> to vector<8x128xf32>
    %162 = arith.addf %160, %161 : vector<8x128xf32>
    %cst_261 = arith.constant 0.000000e+00 : f32
    %163 = vector.broadcast %cst_261 : f32 to vector<8x128xf32>
    %164 = arith.maximumf %162, %163 : vector<8x128xf32>
    %c1_262 = arith.constant 1 : index
    %c0_263 = arith.constant 0 : index
    %c0_264 = arith.constant 0 : index
    %165 = vector.load %arg4[%c1_262, %c0_263, %c0_264] : memref<2x8x128xf32, #tpu.memory_space<vmem>>, vector<1x8x128xf32>
    %166 = vector.shape_cast %165 : vector<1x8x128xf32> to vector<8x128xf32>
    %167 = vector.shape_cast %164 : vector<8x128xf32> to vector<1x8x128xf32>
    tpu.vector_store %arg4[%c1_262, %c0_263, %c0_264], %167 {strides = array<i32>} : memref<2x8x128xf32, #tpu.memory_space<vmem>>, vector<1x8x128xf32>,
    return
  }
  func.func @transform_0(%arg0: i32) -> (i32, i32, i32, i32) {
    %c0_i32 = arith.constant 0 : i32
    %c0_i32_0 = arith.constant 0 : i32
    %c0_i32_1 = arith.constant 0 : i32
    %c0_i32_2 = arith.constant 0 : i32
    return %arg0, %c0_i32, %c0_i32_0, %c0_i32_1 : i32, i32, i32, i32
  }
  func.func @transform_1(%arg0: i32) -> (i32, i32) {
    %c0_i32 = arith.constant 0 : i32
    %c0_i32_0 = arith.constant 0 : i32
    %c0_i32_1 = arith.constant 0 : i32
    return %c0_i32, %c0_i32_0 : i32, i32
  }
  func.func @transform_2(%arg0: i32) -> (i32, i32) {
    %c0_i32 = arith.constant 0 : i32
    %c0_i32_0 = arith.constant 0 : i32
    %c0_i32_1 = arith.constant 0 : i32
    return %c0_i32, %c0_i32_0 : i32, i32
  }
  func.func @transform_3(%arg0: i32) -> (i32, i32, i32) {
    %c0_i32 = arith.constant 0 : i32
    %c0_i32_0 = arith.constant 0 : i32
    %c0_i32_1 = arith.constant 0 : i32
    return %arg0, %c0_i32, %c0_i32_0 : i32, i32, i32
  }
}

</mosaic_0001>

<bundles_post_ra>
// kernel: _bias_conv_impl.1
= control target key start
LH: loop header
LB: loop body
LE: loop exit
PB: predicated region body
PF: predicated region fallthrough
CT: control target
= control target key end

     0   :  { %s906_s18 = smov 127   ;;  %s907_s23 = smov 119   ;;  %v909_v36 = vmov 0.0   ;;  %vm29_vm0 = vcmask 1039360   ;;  %vm59_vm1 = vcmask 973824   ;;  %v910_v51 = vmov 0   ;;  %s1125_s0 = inlined_call_operand.vmem [shape: f32[2,4,4,144], index: 0, kind: input, shape index: {}]   ;;  %s1126_s2 = inlined_call_operand.vmem [shape: f32[8,1], index: 2, kind: input, shape index: {}]   ;;  %s1127_s1 = inlined_call_operand.vmem [shape: f32[8,36], index: 1, kind: input, shape index: {}]   ;;  %s1128_s3 = inlined_call_operand.vmem [shape: f32[2,8,128], index: 3, kind: output, shape index: {}]  }
   0x1   :  { %v808_v0 = vld [vmem:[%s1125_s0 + $0x10] sm:$0xff]  ;;  %v22_v1 = vld [vmem:[%s1125_s0] sm:$0xff]  ;;  %v809_v2 = vld [vmem:[%s1125_s0 + $0x8] sm:$0xff]  ;;  %s908_s30 = smov 118   ;;  %562 = vmatprep.mubr.f32.mxu0 %v909_v36  ;;  %633 = vmatprep.mubr.f32.mxu1 %v909_v36  ;;  %vm80_vm2 = vcmask 965632   ;;  %vm473_vm3 = vcmask 1043456  }
   0x2   :  { %47 = vrot.lane.b32.xlu1 %v808_v0, %s906_s18  ;;  %25 = vrot.lane.b32.xlu0 %v22_v1, %s906_s18  ;;  %v65_v3 = vcombine.low %v809_v2, %v809_v2  ;;  %v44_v4 = vcombine.low %v808_v0, %v808_v0  ;;  %v805_v5 = vld [vmem:[%s1125_s0 + $0x8] sm:$0xf]  ;;  %v807_v6 = vld [vmem:[%s1125_s0 + $0x18] sm:$0xf]  ;;  %v85_v7 = vcombine.low %v22_v1, %v22_v1  ;;  %vm469_vm4 = vcmask 293888  }
   0x3   :  { %84 = vst [vmem:[#allocation2 + $0x8] sm:$0xf] %v805_v5  ;;  %41 = vst [vmem:[#allocation2 + $0x80] sm:$0xf] %v807_v6  ;;  %v102_v8 = vcombine.low %v807_v6, %v807_v6  ;;  %v806_v9 = vld [vmem:[%s1125_s0 + $0x10] sm:$0xf]  ;;  %v19_v10 = vcombine.low %v805_v5, %v805_v5  ;;  %v93_v13 = vcombine.high %v809_v2, %v809_v2  ;;  %883 = vset.pattern.permute.xlu0 %v910_v51 }
   0x4   :  { %184 = vst [vmem:[#allocation2 + $0x18] sm:$0xf] %v807_v6  ;;  %v36_v11 = vcombine.low %v806_v9, %v806_v9  ;;  %143 = vst [vmem:[#allocation2 + $0x10] sm:$0xf] %v806_v9  ;;  %v14_v12 = vld [vmem:[%s1125_s0] sm:$0xf]  ;;  %v24_v16 = vcombine.high %v22_v1, %v22_v1  ;;  %v105_v17 = vcombine.high %v808_v0, %v808_v0 }
   0x5   :  { %104 = vst [vmem:[#allocation2 + $0x48] sm:$0xf0] %v102_v8  ;;  %144 = vst [vmem:[#allocation2 + $0x10] sm:$0xf0] %v102_v8  ;;  %v811_v14 = vld [vmem:[%s1125_s0 + $0x18] sm:$0xff]  ;;  %v822_v20 = vld [vmem:[%s1125_s0 + $0x30] sm:$0xff] }
   0x6   :  { %66 = vrot.lane.b32.xlu1 %v65_v3, %s907_s23  ;;  %45 = vrot.lane.b32.xlu0 %v44_v4, %s906_s18  ;;  %15 = vst [vmem:[#allocation2] sm:$0xf] %v14_v12  ;;  %21 = vst [vmem:[#allocation2] sm:$0xf0] %v19_v10  ;;  %v186_v15 = vcombine.high %v811_v14, %v811_v14  ;;  %v113_v18 = vcombine.low %v811_v14, %v811_v14  ;;  %v821_v19 = vld [vmem:[%s1125_s0 + $0x38] sm:$0xf] }
   0x7   :  { %38 = vst [vmem:[#allocation2 + $0x40] sm:$0xf0] %v36_v11  ;;  %249 = vst [vmem:[#allocation2 + $0xa0] sm:$0xf] %v821_v19  ;;  %v818_v21 = vld [vmem:[%s1125_s0 + $0x28] sm:$0xf]  ;;  %v252_v22 = vcombine.low %v822_v20, %v822_v20  ;;  %v308_v25 = vcombine.low %v821_v19, %v821_v19  ;;  %v311_v37 = vcombine.high %v822_v20, %v822_v20 }
   0x8   :  { %390 = vst [vmem:[#allocation2 + $0x38] sm:$0xf] %v821_v19  ;;  %290 = vst [vmem:[#allocation2 + $0x28] sm:$0xf] %v818_v21  ;;  %v819_v23 = vld [vmem:[%s1125_s0 + $0x20] sm:$0xff]  ;;  %v824_v24 = vld [vmem:[%s1125_s0 + $0x28] sm:$0xff]  ;;  %v228_v29 = vcombine.low %v818_v21, %v818_v21 }
   0x9   :  { %v272_v26 = vcombine.low %v824_v24, %v824_v24  ;;  %310 = vst [vmem:[#allocation2 + $0x68] sm:$0xf0] %v308_v25  ;;  %350 = vst [vmem:[#allocation2 + $0x30] sm:$0xf0] %v308_v25  ;;  %v291_v27 = vcombine.low %v819_v23, %v819_v23  ;;  %v820_v28 = vld [vmem:[%s1125_s0 + $0x30] sm:$0xf]  ;;  %v299_v32 = vcombine.high %v824_v24, %v824_v24 }
   0xa   :  { %68 = vrot.lane.b32.xlu0 %v809_v2, %s907_s23  ;;  %86 = vrot.lane.b32.xlu1 %v85_v7, %s906_s18  ;;  %v244_v30 = vcombine.low %v820_v28, %v820_v28  ;;  %349 = vst [vmem:[#allocation2 + $0x30] sm:$0xf] %v820_v28  ;;  %v817_v31 = vld [vmem:[%s1125_s0 + $0x20] sm:$0xf]  ;;  %230 = vst [vmem:[#allocation2 + $0x20] sm:$0xf0] %v228_v29  ;;  %v233_v35 = vcombine.high %v819_v23, %v819_v23 }
   0xb   :  { %224 = vst [vmem:[#allocation2 + $0x20] sm:$0xf] %v817_v31  ;;  %v827_v33 = vld [vmem:[%s1125_s0 + $0x38] sm:$0xff]  ;;  %v782_v52 = vld [vmem:[%s1126_s2] sm:$0xff] }
   0xc   :  { %246 = vst [vmem:[#allocation2 + $0x60] sm:$0xf0] %v244_v30  ;;  %v392_v34 = vcombine.high %v827_v33, %v827_v33  ;;  %v319_v38 = vcombine.low %v827_v33, %v827_v33  ;;  %v431_v11 = vld [vmem:[#allocation2 + $0x10] sm:$0xff] }
   0xd   :  { %v429_v5 = vld [vmem:[#allocation2] sm:$0xff] }
   0xe   :  { %94 = vrot.lane.b32.xlu0 %v809_v2, %s906_s18  ;;  %96 = vrot.lane.b32.xlu1 %v93_v13, %s906_s18 }
  0x12   :  { %116 = vrot.lane.b32.xlu0 %v811_v14, %s906_s18  ;;  %187 = vrot.lane.b32.xlu1 %v186_v15, %s906_s18 }
  0x16   :  { %55 = vrot.lane.b32.xlu1 %v22_v1, %s907_s23  ;;  %27 = vrot.lane.b32.xlu0 %v24_v16, %s906_s18 }
  0x1a   :  { %147 = vrot.lane.b32.xlu1 %v85_v7, %s907_s23  ;;  %106 = vrot.lane.b32.xlu0 %v105_v17, %s906_s18 }
  0x1e   :  { %78 = vrot.lane.b32.xlu1 %v24_v16, %s908_s30  ;;  %76 = vrot.lane.b32.xlu0 %v22_v1, %s908_s30 }
  0x22   :  { %122 = vrot.lane.b32.xlu1 %v93_v13, %s907_s23  ;;  %114 = vrot.lane.b32.xlu0 %v113_v18, %s906_s18 }
  0x26   :  { %136 = vrot.lane.b32.xlu1 %v809_v2, %s908_s30  ;;  %128 = vrot.lane.b32.xlu0 %v85_v7, %s908_s30 }
  0x2a   :  { %177 = vrot.lane.b32.xlu1 %v808_v0, %s908_s30  ;;  %169 = vrot.lane.b32.xlu0 %v811_v14, %s907_s23 }
  0x2e   :  { %201 = vrot.lane.b32.xlu1 %v186_v15, %s907_s23  ;;  %195 = vrot.lane.b32.xlu0 %v65_v3, %s908_s30 }
  0x32   :  { %57 = vrot.lane.b32.xlu1 %v24_v16, %s907_s23  ;;  %207 = vrot.lane.b32.xlu0 %v44_v4, %s908_s30 }
  0x36   :  { %159 = vrot.lane.b32.xlu1 %v105_v17, %s907_s23  ;;  %157 = vrot.lane.b32.xlu0 %v808_v0, %s907_s23 }
  0x3a   :  { %138 = vrot.lane.b32.xlu1 %v93_v13, %s908_s30  ;;  %167 = vrot.lane.b32.xlu0 %v113_v18, %s907_s23 }
  0x3e   :  { %217 = vrot.lane.b32.xlu1 %v186_v15, %s908_s30  ;;  %215 = vrot.lane.b32.xlu0 %v811_v14, %s908_s30 }
  0x42   :  { %253 = vrot.lane.b32.xlu1 %v252_v22, %s906_s18  ;;  %234 = vrot.lane.b32.xlu0 %v819_v23, %s906_s18 }
  0x46   :  { %273 = vrot.lane.b32.xlu1 %v272_v26, %s907_s23  ;;  %255 = vrot.lane.b32.xlu0 %v822_v20, %s906_s18 }
  0x4a   :  { %292 = vrot.lane.b32.xlu1 %v291_v27, %s906_s18  ;;  %275 = vrot.lane.b32.xlu0 %v824_v24, %s907_s23 }
  0x4e   :  { %302 = vrot.lane.b32.xlu1 %v299_v32, %s906_s18  ;;  %300 = vrot.lane.b32.xlu0 %v824_v24, %s906_s18 }
  0x52   :  { %393 = vrot.lane.b32.xlu1 %v392_v34, %s906_s18  ;;  %322 = vrot.lane.b32.xlu0 %v827_v33, %s906_s18 }
  0x56   :  { %236 = vrot.lane.b32.xlu1 %v233_v35, %s906_s18  ;;  %179 = vrot.lane.b32.xlu0 %v105_v17, %s908_s30 }
  0x5a   :  { %312 = vrot.lane.b32.xlu1 %v311_v37, %s906_s18  ;;  %263 = vrot.lane.b32.xlu0 %v819_v23, %s907_s23 }
  0x5e   :  { %283 = vrot.lane.b32.xlu1 %v819_v23, %s908_s30  ;;  %353 = vrot.lane.b32.xlu0 %v291_v27, %s907_s23 }
  0x62   :  { %320 = vrot.lane.b32.xlu1 %v319_v38, %s906_s18  ;;  %285 = vrot.lane.b32.xlu0 %v233_v35, %s908_s30 }
  0x66   :  { %334 = vrot.lane.b32.xlu1 %v291_v27, %s908_s30  ;;  %328 = vrot.lane.b32.xlu0 %v299_v32, %s907_s23 }
  0x6a   :  { %375 = vrot.lane.b32.xlu1 %v827_v33, %s907_s23  ;;  %342 = vrot.lane.b32.xlu0 %v824_v24, %s908_s30 }
  0x6e   :  { %401 = vrot.lane.b32.xlu1 %v272_v26, %s908_s30  ;;  %383 = vrot.lane.b32.xlu0 %v822_v20, %s908_s30 }
  0x72   :  { %413 = vrot.lane.b32.xlu1 %v252_v22, %s908_s30  ;;  %407 = vrot.lane.b32.xlu0 %v392_v34, %s907_s23 }
  0x74   :  { %v48_v39 = vpop.permute.xlu1 %47  ;;  %v26_v40 = vpop.permute.xlu0 %25 }
  0x76   :  { %363 = vrot.lane.b32.xlu1 %v822_v20, %s907_s23  ;;  %265 = vrot.lane.b32.xlu0 %v233_v35, %s907_s23 }
  0x78   :  { %v67_v41 = vpop.permute.xlu1 %66  ;;  %v46_v42 = vpop.permute.xlu0 %45 }
  0x79   :  { %v49_v43 = vsel %vm29_vm0, %v46_v42, %v48_v39 }
  0x7a   :  { %51 = vst [vmem:[#allocation2 + $0x80] sm:$0xf0] %v49_v43  ;;  %185 = vst [vmem:[#allocation2 + $0x18] sm:$0xf0] %v49_v43  ;;  %373 = vrot.lane.b32.xlu1 %v319_v38, %s907_s23  ;;  %365 = vrot.lane.b32.xlu0 %v311_v37, %s907_s23 }
  0x7c   :  { %v69_v44 = vpop.permute.xlu0 %68  ;;  %v87_v45 = vpop.permute.xlu1 %86 }
  0x7d   :  { %v70_v46 = vsel %vm59_vm1, %v67_v41, %v69_v44  ;;  %v88_v47 = vsel %vm29_vm0, %v87_v45, %v26_v40 }
  0x7e   :  { %72 = vst [vmem:[#allocation2 + $0xc0] sm:$0xf0] %v70_v46  ;;  %192 = vst [vmem:[#allocation2 + $0x58] sm:$0xf0] %v70_v46  ;;  %421 = vrot.lane.b32.xlu1 %v827_v33, %s908_s30  ;;  %344 = vrot.lane.b32.xlu0 %v299_v32, %s908_s30 }
  0x7f   :  { %90 = vst [vmem:[#allocation2 + $0x8] sm:$0xf0] %v88_v47 }
  0x80   :  { %v95_v48 = vpop.permute.xlu0 %94  ;;  %v97_v49 = vpop.permute.xlu1 %96 }
  0x81   :  { %v98_v50 = vsel %vm29_vm0, %v95_v48, %v97_v49  ;;  %v432_v2 = vld [vmem:[#allocation2 + $0x18] sm:$0xff] }
  0x82   :  { %100 = vst [vmem:[#allocation2 + $0x48] sm:$0xf] %v98_v50  ;;  %385 = vrot.lane.b32.xlu1 %v311_v37, %s908_s30  ;;  %423 = vrot.lane.b32.xlu0 %v392_v34, %s908_s30 }
  0x84   :  { %v117_v53 = vpop.permute.xlu0 %116  ;;  %v188_v54 = vpop.permute.xlu1 %187 }
  0x85   :  { %v189_v55 = vsel %vm29_vm0, %v117_v53, %v188_v54 }
  0x86   :  { %191 = vst [vmem:[#allocation2 + $0x58] sm:$0xf] %v189_v55  ;;  %788 = vperm.xlu0 %883, %v782_v52   ;;  %v430_v59 = vld [vmem:[#allocation2 + $0x8] sm:$0xff] }
  0x88   :  { %v56_v56 = vpop.permute.xlu1 %55  ;;  %v28_v57 = vpop.permute.xlu0 %27 }
  0x89   :  { %v30_v58 = vsel %vm29_vm0, %v26_v40, %v28_v57  ;;  %v438_v60 = vld [vmem:[#allocation2 + $0x48] sm:$0xff]  ;;  %v445_v40 = vld [vmem:[#allocation2 + $0x80] sm:$0xff] }
  0x8a   :  { %32 = vst [vmem:[#allocation2 + $0x40] sm:$0xf] %v30_v58  ;;  %v846_v61 = vpack.c.bf16 %v438_v60, %v430_v59 }
  0x8c   :  { %v148_v62 = vpop.permute.xlu1 %147  ;;  %v107_v63 = vpop.permute.xlu0 %106  ;;  %847 = vmatprep.subr.bf16.mxu0 %v846_v61 }
  0x8d   :  { %v149_v0 = vsel %vm59_vm1, %v148_v62, %v56_v56  ;;  %v108_v1 = vsel %vm29_vm0, %v48_v39, %v107_v63  ;;  %v440_v3 = vld [vmem:[#allocation2 + $0x58] sm:$0xff] }
  0x8e   :  { %151 = vst [vmem:[#allocation2 + $0x50] sm:$0xf0] %v149_v0  ;;  %110 = vst [vmem:[#allocation2 + $0x88] sm:$0xf] %v108_v1  ;;  %v854_v4 = vpack.c.bf16 %v440_v3, %v432_v2 }
  0x8f   :  { %145 = vst [vmem:[#allocation2 + $0x50] sm:$0xf] %v108_v1 }
  0x90   :  { %855 = vmatprep.subr.bf16.mxu1 %v854_v4  ;;  %v79_v6 = vpop.permute.xlu1 %78  ;;  %v77_v7 = vpop.permute.xlu0 %76 }
  0x91   :  { %v81_v8 = vsel %vm80_vm2, %v77_v7, %v79_v6  ;;  %v437_v9 = vld [vmem:[#allocation2 + $0x40] sm:$0xff] }
  0x92   :  { %83 = vst [vmem:[#allocation2 + $0x100] sm:$0xf] %v81_v8  ;;  %193 = vst [vmem:[#allocation2 + $0x98] sm:$0xf] %v81_v8  ;;  %v848_v10 = vpack.c.bf16 %v437_v9, %v429_v5 }
  0x94   :  { %v123_v12 = vpop.permute.xlu1 %122  ;;  %v115_v13 = vpop.permute.xlu0 %114  ;;  %849 = vmatpush1.bf16.msra.mxu0 %v848_v10 }
  0x95   :  { %v124_v14 = vsel %vm59_vm1, %v69_v44, %v123_v12  ;;  %v118_v15 = vsel %vm29_vm0, %v115_v13, %v117_v53  ;;  %v1076_v53 = vld [vmem:[%s1127_s1] sm:$0xff] }
  0x96   :  { %v439_v16 = vld [vmem:[#allocation2 + $0x50] sm:$0xff]  ;;  %126 = vst [vmem:[#allocation2 + $0xc8] sm:$0xf] %v124_v14  ;;  %152 = vst [vmem:[#allocation2 + $0x90] sm:$0xf] %v124_v14 }
  0x97   :  { %120 = vst [vmem:[#allocation2 + $0x88] sm:$0xf0] %v118_v15  ;;  %v856_v17 = vpack.c.bf16 %v439_v16, %v431_v11 }
  0x98   :  { %v137_v18 = vpop.permute.xlu1 %136  ;;  %v129_v19 = vpop.permute.xlu0 %128 }
  0x99   :  { %857 = vmatpush1.bf16.msra.mxu1 %v856_v17  ;;  %v130_v20 = vsel %vm80_vm2, %v129_v19, %v77_v7  ;;  %v461_v57 = vld [vmem:[#allocation2 + $0x100] sm:$0xf] }
  0x9a   :  { %132 = vst [vmem:[#allocation2 + $0xc8] sm:$0xf0] %v130_v20  ;;  %153 = vst [vmem:[#allocation2 + $0x90] sm:$0xf0] %v130_v20  ;;  %v433_v20 = vld [vmem:[#allocation2 + $0x20] sm:$0xff] }
  0x9c   :  { %v1062_v21 = vpop.permute.xlu1 %177  ;;  %v170_v22 = vpop.permute.xlu0 %169 }
  0x9e   :  { %v446_v27 = vld [vmem:[#allocation2 + $0x88] sm:$0xff] }
  0xa0   :  { %v202_v23 = vpop.permute.xlu1 %201  ;;  %v196_v24 = vpop.permute.xlu0 %195 }
  0xa1   :  { %v203_v25 = vsel %vm59_vm1, %v170_v22, %v202_v23  ;;  %v197_v26 = vsel %vm80_vm2, %v196_v24, %v137_v18  ;;  %v454_v28 = vld [vmem:[#allocation2 + $0xc8] sm:$0xff]  ;;  %v447_v55 = vld [vmem:[#allocation2 + $0x90] sm:$0xff] }
  0xa2   :  { %205 = vst [vmem:[#allocation2 + $0xd8] sm:$0xf] %v203_v25  ;;  %199 = vst [vmem:[#allocation2 + $0x98] sm:$0xf0] %v197_v26  ;;  %v850_v29 = vpack.c.bf16 %v454_v28, %v446_v27 }
  0xa4   :  { %v58_v30 = vpop.permute.xlu1 %57  ;;  %v208_v31 = vpop.permute.xlu0 %207  ;;  %851 = vmatprep.subr.bf16.mxu0 %v850_v29 }
  0xa5   :  { %v60_v32 = vsel %vm59_vm1, %v56_v56, %v58_v30  ;;  %v209_v33 = vsel %vm80_vm2, %v208_v31, %v1062_v21 }
  0xa6   :  { %62 = vst [vmem:[#allocation2 + $0xc0] sm:$0xf] %v60_v32  ;;  %211 = vst [vmem:[#allocation2 + $0xd8] sm:$0xf0] %v209_v33  ;;  %v435_v33 = vld [vmem:[#allocation2 + $0x30] sm:$0xff] }
  0xa8   :  { %v160_v34 = vpop.permute.xlu1 %159  ;;  %v158_v35 = vpop.permute.xlu0 %157 }
  0xa9   :  { %v161_v37 = vsel %vm59_vm1, %v158_v35, %v160_v34  ;;  %v448_v43 = vld [vmem:[#allocation2 + $0x98] sm:$0xff] }
  0xaa   :  { %163 = vst [vmem:[#allocation2 + $0xd0] sm:$0xf] %v161_v37 }
  0xac   :  { %v139_v38 = vpop.permute.xlu1 %138  ;;  %v168_v39 = vpop.permute.xlu0 %167 }
  0xad   :  { %v140_v41 = vsel %vm80_vm2, %v137_v18, %v139_v38  ;;  %v171_v42 = vsel %vm59_vm1, %v168_v39, %v170_v22  ;;  %v456_v44 = vld [vmem:[#allocation2 + $0xd8] sm:$0xff]  ;;  %v453_v45 = vld [vmem:[#allocation2 + $0xc0] sm:$0xff] }
  0xae   :  { %142 = vst [vmem:[#allocation2 + $0x108] sm:$0xf] %v140_v41  ;;  %173 = vst [vmem:[#allocation2 + $0xd0] sm:$0xf0] %v171_v42  ;;  %v858_v46 = vpack.c.bf16 %v456_v44, %v448_v43  ;;  %v852_v47 = vpack.c.bf16 %v453_v45, %v445_v40 }
  0xb0   :  { %v218_v48 = vpop.permute.xlu1 %217  ;;  %859 = vmatprep.subr.bf16.mxu1 %v858_v46  ;;  %v216_v49 = vpop.permute.xlu0 %215  ;;  %853 = vmatpush1.bf16.msra.mxu0 %v852_v47 }
  0xb1   :  { %v219_v50 = vsel %vm80_vm2, %v216_v49, %v218_v48 }
  0xb2   :  { %221 = vst [vmem:[#allocation2 + $0x118] sm:$0xf] %v219_v50 }
  0xb4   :  { %v254_v51 = vpop.permute.xlu1 %253  ;;  %v235_v52 = vpop.permute.xlu0 %234 }
  0xb5   :  { %v462_v54 = vld [vmem:[#allocation2 + $0x108] sm:$0xf]  ;;  %v455_v56 = vld [vmem:[#allocation2 + $0xd0] sm:$0xff] }
  0xb6   :  { %833 = vmatprep.subr.msk.mxu0 %vm473_vm3, %v462_v54  ;;  %v860_v58 = vpack.c.bf16 %v455_v56, %v447_v55 }
  0xb7   :  { %834 = vmatpush1.msk.msra.mxu0 %vm473_vm3, %v461_v57 }
  0xb8   :  { %v274_v59 = vpop.permute.xlu1 %273  ;;  %861 = vmatpush1.bf16.msra.mxu1 %v860_v58  ;;  %v256_v60 = vpop.permute.xlu0 %255  ;;  %835 = vmatmul.mubr.msk.f32.vlgmr.msra.gmra.mrb[0].mxu0 %vm469_vm4, %v1076_v53 }
  0xb9   :  { %v257_v61 = vsel %vm29_vm0, %v254_v51, %v256_v60  ;;  %v464_v62 = vld [vmem:[#allocation2 + $0x118] sm:$0xf]  ;;  %704 = vmatprep.mubr.f32.mxu0 %v909_v36 }
  0xba   :  { %259 = vst [vmem:[#allocation2 + $0xa0] sm:$0xf0] %v257_v61  ;;  %391 = vst [vmem:[#allocation2 + $0x38] sm:$0xf0] %v257_v61  ;;  %836 = vmatprep.subr.msk.mxu1 %vm473_vm3, %v464_v62 }
  0xbc   :  { %v293_v63 = vpop.permute.xlu1 %292  ;;  %v276_v0 = vpop.permute.xlu0 %275 }
  0xbd   :  { %v294_v1 = vsel %vm29_vm0, %v293_v63, %v235_v52  ;;  %v277_v2 = vsel %vm59_vm1, %v274_v59, %v276_v0 }
  0xbe   :  { %296 = vst [vmem:[#allocation2 + $0x28] sm:$0xf0] %v294_v1  ;;  %279 = vst [vmem:[#allocation2 + $0xe0] sm:$0xf0] %v277_v2 }
  0xbf   :  { %398 = vst [vmem:[#allocation2 + $0x78] sm:$0xf0] %v277_v2 }
  0xc0   :  { %v303_v3 = vpop.permute.xlu1 %302  ;;  %v301_v4 = vpop.permute.xlu0 %300 }
  0xc1   :  { %v304_v5 = vsel %vm29_vm0, %v301_v4, %v303_v3  ;;  %v436_v24 = vld [vmem:[#allocation2 + $0x38] sm:$0xff]  ;;  %v449_v2 = vld [vmem:[#allocation2 + $0xa0] sm:$0xff] }
  0xc2   :  { %306 = vst [vmem:[#allocation2 + $0x68] sm:$0xf] %v304_v5 }
  0xc4   :  { %v394_v6 = vpop.permute.xlu1 %393  ;;  %v323_v7 = vpop.permute.xlu0 %322 }
  0xc5   :  { %v395_v8 = vsel %vm29_vm0, %v323_v7, %v394_v6  ;;  %v434_v13 = vld [vmem:[#allocation2 + $0x28] sm:$0xff] }
  0xc6   :  { %397 = vst [vmem:[#allocation2 + $0x78] sm:$0xf] %v395_v8 }
  0xc8   :  { %v237_v9 = vpop.permute.xlu1 %236  ;;  %v180_v10 = vpop.permute.xlu0 %179 }
  0xc9   :  { %v238_v11 = vsel %vm29_vm0, %v235_v52, %v237_v9  ;;  %v181_v12 = vsel %vm80_vm2, %v1062_v21, %v180_v10  ;;  %v442_v14 = vld [vmem:[#allocation2 + $0x68] sm:$0xff] }
  0xca   :  { %240 = vst [vmem:[#allocation2 + $0x60] sm:$0xf] %v238_v11  ;;  %183 = vst [vmem:[#allocation2 + $0x110] sm:$0xf] %v181_v12  ;;  %v862_v15 = vpack.c.bf16 %v442_v14, %v434_v13 }
  0xcc   :  { %v313_v16 = vpop.permute.xlu1 %312  ;;  %v264_v17 = vpop.permute.xlu0 %263  ;;  %863 = vmatprep.subr.bf16.mxu0 %v862_v15 }
  0xcd   :  { %v314_v18 = vsel %vm29_vm0, %v256_v60, %v313_v16  ;;  %v444_v19 = vld [vmem:[#allocation2 + $0x78] sm:$0xff] }
  0xce   :  { %316 = vst [vmem:[#allocation2 + $0xa8] sm:$0xf] %v314_v18  ;;  %351 = vst [vmem:[#allocation2 + $0x70] sm:$0xf] %v314_v18  ;;  %v870_v26 = vpack.c.bf16 %v444_v19, %v436_v24 }
  0xd0   :  { %v284_v22 = vpop.permute.xlu1 %283  ;;  %v354_v23 = vpop.permute.xlu0 %353 }
  0xd1   :  { %v355_v25 = vsel %vm59_vm1, %v354_v23, %v264_v17  ;;  %v463_v21 = vld [vmem:[#allocation2 + $0x110] sm:$0xf]  ;;  %v441_v27 = vld [vmem:[#allocation2 + $0x60] sm:$0xff] }
  0xd2   :  { %357 = vst [vmem:[#allocation2 + $0x70] sm:$0xf0] %v355_v25  ;;  %837 = vmatpush1.msk.msra.mxu1 %vm473_vm3, %v463_v21  ;;  %v864_v28 = vpack.c.bf16 %v441_v27, %v433_v20 }
  0xd3   :  { %871 = vmatprep.subr.bf16.mxu1 %v870_v26  ;;  %838 = vmatmul.mubr.msk.f32.vlgmr.msra.gmra.mrb[0].mxu1 %vm469_vm4, %v1076_v53 }
  0xd4   :  { %v321_v29 = vpop.permute.xlu1 %320  ;;  %v286_v30 = vpop.permute.xlu0 %285  ;;  %865 = vmatpush1.bf16.msra.mxu0 %v864_v28  ;;  %775 = vmatprep.mubr.f32.mxu1 %v909_v36 }
  0xd5   :  { %v324_v31 = vsel %vm29_vm0, %v321_v29, %v323_v7  ;;  %v287_v32 = vsel %vm80_vm2, %v284_v22, %v286_v30 }
  0xd6   :  { %326 = vst [vmem:[#allocation2 + $0xa8] sm:$0xf0] %v324_v31  ;;  %289 = vst [vmem:[#allocation2 + $0x120] sm:$0xf] %v287_v32 }
  0xd7   :  { %399 = vst [vmem:[#allocation2 + $0xb8] sm:$0xf] %v287_v32 }
  0xd8   :  { %v335_v34 = vpop.permute.xlu1 %334  ;;  %v329_v35 = vpop.permute.xlu0 %328 }
  0xd9   :  { %v336_v37 = vsel %vm80_vm2, %v335_v34, %v284_v22  ;;  %v330_v38 = vsel %vm59_vm1, %v276_v0, %v329_v35  ;;  %v443_v39 = vld [vmem:[#allocation2 + $0x70] sm:$0xff] }
  0xda   :  { %338 = vst [vmem:[#allocation2 + $0xe8] sm:$0xf0] %v336_v37  ;;  %359 = vst [vmem:[#allocation2 + $0xb0] sm:$0xf0] %v336_v37  ;;  %v872_v36 = vpack.c.bf16 %v443_v39, %v435_v33 }
  0xdb   :  { %332 = vst [vmem:[#allocation2 + $0xe8] sm:$0xf] %v330_v38  ;;  %358 = vst [vmem:[#allocation2 + $0xb0] sm:$0xf] %v330_v38 }
  0xdc   :  { %v376_v40 = vpop.permute.xlu1 %375  ;;  %873 = vmatpush1.bf16.msra.mxu1 %v872_v36  ;;  %v343_v41 = vpop.permute.xlu0 %342 }
  0xdd   :  { %v450_v45 = vld [vmem:[#allocation2 + $0xa8] sm:$0xff]  ;;  %v465_v13 = vld [vmem:[#allocation2 + $0x120] sm:$0xf] }
  0xe0   :  { %v402_v42 = vpop.permute.xlu1 %401  ;;  %v384_v43 = vpop.permute.xlu0 %383 }
  0xe1   :  { %v403_v44 = vsel %vm80_vm2, %v402_v42, %v343_v41 }
  0xe2   :  { %v458_v46 = vld [vmem:[#allocation2 + $0xe8] sm:$0xff]  ;;  %405 = vst [vmem:[#allocation2 + $0xb8] sm:$0xf0] %v403_v44  ;;  %v451_v9 = vld [vmem:[#allocation2 + $0xb0] sm:$0xff] }
  0xe3   :  { %v866_v47 = vpack.c.bf16 %v458_v46, %v450_v45 }
  0xe4   :  { %v414_v48 = vpop.permute.xlu1 %413  ;;  %v408_v49 = vpop.permute.xlu0 %407 }
  0xe5   :  { %867 = vmatprep.subr.bf16.mxu0 %v866_v47  ;;  %v415_v50 = vsel %vm80_vm2, %v414_v48, %v384_v43  ;;  %v409_v51 = vsel %vm59_vm1, %v376_v40, %v408_v49 }
  0xe6   :  { %417 = vst [vmem:[#allocation2 + $0xf8] sm:$0xf0] %v415_v50  ;;  %411 = vst [vmem:[#allocation2 + $0xf8] sm:$0xf] %v409_v51 }
  0xe8   :  { %v364_v52 = vpop.permute.xlu1 %363  ;;  %v266_v54 = vpop.permute.xlu0 %265 }
  0xe9   :  { %v267_v55 = vsel %vm59_vm1, %v264_v17, %v266_v54  ;;  %v452_v60 = vld [vmem:[#allocation2 + $0xb8] sm:$0xff] }
  0xea   :  { %269 = vst [vmem:[#allocation2 + $0xe0] sm:$0xf] %v267_v55 }
  0xec   :  { %v374_v56 = vpop.permute.xlu1 %373  ;;  %v366_v57 = vpop.permute.xlu0 %365 }
  0xed   :  { %v377_v58 = vsel %vm59_vm1, %v374_v56, %v376_v40  ;;  %v367_v59 = vsel %vm59_vm1, %v364_v52, %v366_v57  ;;  %v460_v61 = vld [vmem:[#allocation2 + $0xf8] sm:$0xff] }
  0xee   :  { %379 = vst [vmem:[#allocation2 + $0xf0] sm:$0xf0] %v377_v58  ;;  %369 = vst [vmem:[#allocation2 + $0xf0] sm:$0xf] %v367_v59  ;;  %v874_v62 = vpack.c.bf16 %v460_v61, %v452_v60 }
  0xf0   :  { %v422_v63 = vpop.permute.xlu1 %421  ;;  %875 = vmatprep.subr.bf16.mxu1 %v874_v62  ;;  %v345_v0 = vpop.permute.xlu0 %344 }
  0xf1   :  { %v346_v1 = vsel %vm80_vm2, %v343_v41, %v345_v0  ;;  %v457_v3 = vld [vmem:[#allocation2 + $0xe0] sm:$0xff] }
  0xf2   :  { %348 = vst [vmem:[#allocation2 + $0x128] sm:$0xf] %v346_v1  ;;  %v868_v4 = vpack.c.bf16 %v457_v3, %v449_v2 }
  0xf4   :  { %v386_v5 = vpop.permute.xlu1 %385  ;;  %v424_v6 = vpop.permute.xlu0 %423  ;;  %869 = vmatpush1.bf16.msra.mxu0 %v868_v4 }
  0xf5   :  { %v387_v7 = vsel %vm80_vm2, %v384_v43, %v386_v5  ;;  %v425_v8 = vsel %vm80_vm2, %v422_v63, %v424_v6  ;;  %v459_v10 = vld [vmem:[#allocation2 + $0xf0] sm:$0xff] }
  0xf6   :  { %389 = vst [vmem:[#allocation2 + $0x130] sm:$0xf] %v387_v7  ;;  %427 = vst [vmem:[#allocation2 + $0x138] sm:$0xf] %v425_v8  ;;  %v876_v11 = vpack.c.bf16 %v459_v10, %v451_v9 }
  0xf8   :  { %877 = vmatpush1.bf16.msra.mxu1 %v876_v11 }
  0xf9   :  { %v466_v12 = vld [vmem:[#allocation2 + $0x128] sm:$0xf] }
  0xfa   :  { %839 = vmatprep.subr.msk.mxu0 %vm473_vm3, %v466_v12 }
  0xfb   :  { %840 = vmatpush1.msk.msra.mxu0 %vm473_vm3, %v465_v13 }
  0xfc   :  { %841 = vmatmul.mubr.msk.f32.vlgmr.msra.gmra.mrb[2].mxu0 %vm469_vm4, %v1076_v53 }
  0xfd   :  { %v468_v14 = vld [vmem:[#allocation2 + $0x138] sm:$0xf]  ;;  %v467_v15 = vld [vmem:[#allocation2 + $0x130] sm:$0xf] }
  0xfe   :  { %842 = vmatprep.subr.msk.mxu1 %vm473_vm3, %v468_v14 }
  0xff   :  { %843 = vmatpush1.msk.msra.mxu1 %vm473_vm3, %v467_v15 }
 0x100   :  { %844 = vmatmul.mubr.msk.f32.vlgmr.msra.gmra.mrb[2].mxu1 %vm469_vm4, %v1076_v53 }
 0x105   :  { %v789_v23 = vpop.permute.xlu0 %788 }
 0x18b   :  { %v564_v16 = vpop.f32.mrb[0].mxu0 }
 0x18c   :  { %v566_v17 = vpop.f32.mrb[1].mxu0 }
 0x18d   :  { %v783_v18 = vmax.f32 %v564_v16, %v566_v17 }
 0x1a6   :  { %v635_v19 = vpop.f32.mrb[0].mxu1 }
 0x1a7   :  { %v637_v20 = vpop.f32.mrb[1].mxu1 }
 0x1a8   :  { %v784_v22 = vmax.f32 %v635_v19, %v637_v20 }
 0x1aa   :  { %v785_v24 = vmax.f32 %v783_v18, %v784_v22 }
 0x1ac   :  { %v791_v25 = vadd.f32 %v789_v23, %v785_v24 }
 0x1ae   :  { %v792_v21 = vmax.f32 %v791_v25, 0.0 }
 0x1b0   :  { %793 = vst [vmem:[%s1128_s3] sm:$0xff] %v792_v21 }
 0x1cf   :  { %v706_v26 = vpop.f32.mrb[2].mxu0 }
 0x1d0   :  { %v708_v27 = vpop.f32.mrb[3].mxu0 }
 0x1d1   :  { %v794_v28 = vmax.f32 %v706_v26, %v708_v27 }
 0x1d3   :  { %v777_v29 = vpop.f32.mrb[2].mxu1 }
 0x1d4   :  { %v779_v30 = vpop.f32.mrb[3].mxu1 }
 0x1d5   :  { %v795_v53 = vmax.f32 %v777_v29, %v779_v30 }
 0x1d7   :  { %v796_v31 = vmax.f32 %v794_v28, %v795_v53 }
 0x1d9   :  { %v797_v32 = vadd.f32 %v796_v31, %v789_v23 }
 0x1db   :  { %v798_v33 = vmax.f32 %v797_v32, 0.0 }
 0x1dd   :  { %845 = vst [vmem:[%s1128_s3 + $0x8] sm:$0xff] %v798_v33 }

</bundles_post_ra>
